<compile_context>
chip_gen: v6e
topology: v6e:2x2x1
jax: 0.10.0
libtpu: 0.0.40
codegen_flags: <defaults>
</compile_context>

<pallas_src>
import jax
import jax.numpy as jnp
from jax.experimental import pallas as pl
from jax.experimental.pallas import tpu as pltpu

LEAKY_SLOPE = 0.2
BN_EPS = 1e-5
LANE = 128


def _round_up(x, m):
    return ((x + m - 1) // m) * m


def _halo_pad(val, c_pad):
    """(H, W, C) -> (H+2, W+2, C+c_pad): zero 1-pixel spatial halo + zero channel pad.

    Built with lane / sublane / leading-dim concats so the padded tile can be written
    to the VMEM scratch with a single full store per step (no separate memset)."""
    h, w, c = val.shape
    dt = val.dtype
    if c_pad:
        val = jnp.concatenate([val, jnp.zeros((h, w, c_pad), dt)], axis=2)
    cw = c + c_pad
    zc = jnp.zeros((h, 1, cw), dt)
    val = jnp.concatenate([zc, val, zc], axis=1)
    zr = jnp.zeros((1, w + 2, cw), dt)
    return jnp.concatenate([zr, val, zr], axis=0)


# ---------------------------------------------------------------------------
# Fused kernel: maxpool(2) -> conv3x3+BN+LeakyReLU -> conv3x3+BN+LeakyReLU
# ---------------------------------------------------------------------------
def _down_fused_kernel(x_ref, w1_ref, t1_ref, w2_ref, t2_ref, o_ref,
                       pool_ref, mid_ref):
    # x_ref : (1, Ho, 2, Wo, 2*Cin) bf16  -- H pair on axis 2, W pair packed on lanes
    # w*_ref: (9*C_p, CoutP)        bf16  -- (ky, kx, ci) rows, BN scale folded in
    # t*_ref: (1, CoutP)            f32   -- folded conv-bias + BN shift
    # o_ref : (1, Ho, Wo, out_ch)   f32   -- unpadded channels (masked lane store)
    # pool_ref: (Ho+2, Wo+2, CinP)  bf16 VMEM scratch (zero-haloed pooled image)
    # mid_ref : (Ho+2, Wo+2, CoutP) bf16 VMEM scratch (zero-haloed conv1 output)
    _, Ho, Wo, out_ch = o_ref.shape
    cin = x_ref.shape[-1] // 2
    cin_p = pool_ref.shape[-1]
    cout_p = mid_ref.shape[-1]

    # ---- 2x2 max pool, stride 2 (plain contiguous loads, no strided slices) -------
    rows = jnp.maximum(x_ref[0, :, 0, :, :], x_ref[0, :, 1, :, :])   # (Ho, Wo, 2*Cin)
    pooled = jnp.maximum(rows[:, :, :cin], rows[:, :, cin:])         # (Ho, Wo, Cin)

    # "same" zero halo + channel padding to lane width, built in registers, one store.
    pool_ref[...] = _halo_pad(pooled, cin_p - cin).astype(pool_ref.dtype)

    def conv3x3_bn_lrelu(src_ref, w_ref, t_ref):
        # One MXU matmul per kernel row: K = 3*C (3x smaller transient than full im2col).
        c = src_ref.shape[-1]
        acc = None
        for dy in range(3):
            taps = [src_ref[dy:dy + Ho, dx:dx + Wo, :] for dx in range(3)]
            patch = jnp.concatenate(taps, axis=-1).reshape(Ho * Wo, 3 * c)
            part = jnp.dot(patch, w_ref[dy * 3 * c:(dy + 1) * 3 * c, :],
                           preferred_element_type=jnp.float32)
            acc = part if acc is None else acc + part
        y = acc + t_ref[...]                        # BN scale already folded into w
        return jnp.where(y > 0, y, LEAKY_SLOPE * y)  # LeakyReLU(0.2)

    # ---- conv1 -> BN -> LeakyReLU; kept zero-haloed in VMEM ------------------------
    y1 = conv3x3_bn_lrelu(pool_ref, w1_ref, t1_ref)
    mid_ref[...] = _halo_pad(y1.reshape(Ho, Wo, cout_p), 0).astype(mid_ref.dtype)

    # ---- conv2 -> BN -> LeakyReLU; unpadded channel store to HBM -------------------
    y2 = conv3x3_bn_lrelu(mid_ref, w2_ref, t2_ref)
    o_ref[0] = y2.reshape(Ho, Wo, cout_p)[:, :, :out_ch].astype(o_ref.dtype)


# ---------------------------------------------------------------------------
# Parameters (deterministic, synthetic) -- packed for the kernel
# ---------------------------------------------------------------------------
def _init_conv_bn(key, cin, cout):
    k1, k2, k3, k4, k5, k6 = jax.random.split(key, 6)
    w = jax.random.normal(k1, (3, 3, cin, cout), jnp.float32) / jnp.sqrt(9.0 * cin)
    b = 0.1 * jax.random.normal(k2, (cout,), jnp.float32)
    gamma = 1.0 + 0.1 * jax.random.normal(k3, (cout,), jnp.float32)
    beta = 0.1 * jax.random.normal(k4, (cout,), jnp.float32)
    rmean = 0.1 * jax.random.normal(k5, (cout,), jnp.float32)
    rvar = 1.0 + jax.random.uniform(k6, (cout,), jnp.float32)
    # eval-mode BN folded to a per-channel affine:
    #   y = (conv(x) + b - rmean) * gamma / sqrt(rvar + eps) + beta
    scale = gamma / jnp.sqrt(rvar + BN_EPS)
    shift = (b - rmean) * scale + beta
    w_folded = w * scale                    # fold BN scale into the conv weights (f32)
    return w_folded, shift


def _pack_w(w, cin_p, cout_p):
    kh, kw, cin, cout = w.shape
    w = jnp.pad(w, ((0, 0), (0, 0), (0, cin_p - cin), (0, cout_p - cout)))
    return w.reshape(kh * kw * cin_p, cout_p).astype(jnp.bfloat16)


def _pack_vec(v, cout_p):
    return jnp.pad(v, ((0, cout_p - v.shape[0]),)).reshape(1, cout_p).astype(jnp.float32)


def init_down_params(key, in_ch, out_ch):
    cin_p = _round_up(in_ch, LANE)
    cout_p = _round_up(out_ch, LANE)
    k1, k2 = jax.random.split(key)
    w1f, t1 = _init_conv_bn(k1, in_ch, out_ch)
    w2f, t2 = _init_conv_bn(k2, out_ch, out_ch)
    return {
        "w1": _pack_w(w1f, cin_p, cout_p), "t1": _pack_vec(t1, cout_p),
        "w2": _pack_w(w2f, cout_p, cout_p), "t2": _pack_vec(t2, cout_p),
        "out_ch": out_ch,
        # unpadded f32 copies, used only by the pure-JAX reference
        "ref": {"w1": w1f, "t1": t1, "w2": w2f, "t2": t2},
    }


# ---------------------------------------------------------------------------
# down.forward
# ---------------------------------------------------------------------------
def down_forward(x_nchw, params):
    # TODO(synk): BatchNorm2d runs in eval mode (running stats folded into an affine);
    # training-mode batch statistics are not computed.
    w1, t1, w2, t2 = params["w1"], params["t1"], params["w2"], params["t2"]
    out_ch = params["out_ch"]
    cin_p = w1.shape[0] // 9
    cout_p = w1.shape[1]

    x = jnp.transpose(x_nchw, (0, 2, 3, 1)).astype(jnp.bfloat16)   # NCHW -> NHWC, bf16
    N, H, W, Cin = x.shape
    assert cin_p == _round_up(Cin, LANE) and cin_p >= Cin
    # PyTorch MaxPool2d(2) floors odd spatial dims (drops trailing row / column).
    if H % 2 or W % 2:
        H, W = 2 * (H // 2), 2 * (W // 2)
        x = x[:, :H, :W, :]
    Ho, Wo = H // 2, W // 2
    # Free row-major reshape: H -> (Ho, 2) row pairs, (W, C) -> (Wo, 2*C), so the W pair
    # sits on the lane axis. Natural (unpadded) Cin is DMA'd -- no HBM channel padding.
    x = x.reshape(N, Ho, 2, Wo, 2 * Cin)

    # explicit VMEM budget from the actual block sizes (double buffers + scratch + transients)
    bpe_bf16, bpe_f32 = 2, 4
    in_blk = Ho * 2 * Wo * (2 * Cin) * bpe_bf16
    out_blk = Ho * Wo * out_ch * bpe_f32
    weights = (w1.size + w2.size) * bpe_bf16 + (t1.size + t2.size) * bpe_f32
    scratch = (Ho + 2) * (Wo + 2) * (cin_p + cout_p) * bpe_bf16
    transients = Ho * Wo * 3 * max(cin_p, cout_p) * bpe_bf16 + 2 * Ho * Wo * cout_p * bpe_f32
    est = 2 * (in_blk + out_blk + weights) + scratch + transients
    vmem_limit = int(min(64 << 20, max(2 * est, 16 << 20)))

    # TODO(synk): for real U-Net resolutions add a second ("parallel") row-block grid axis
    # with a 2-row pooled halo (manual DMA from a pl.ANY input) so blocks fit v7x's 64 MiB
    # VMEM; full-image blocks are used here because the toy shapes fit comfortably.
    y = pl.pallas_call(
        _down_fused_kernel,
        out_shape=jax.ShapeDtypeStruct((N, Ho, Wo, out_ch), jnp.float32),
        grid=(N,),
        in_specs=[
            pl.BlockSpec((1, Ho, 2, Wo, 2 * Cin), lambda n: (n, 0, 0, 0, 0)),
            pl.BlockSpec((9 * cin_p, cout_p), lambda n: (0, 0)),   # weights / shifts stay
            pl.BlockSpec((1, cout_p), lambda n: (0, 0)),           # resident (same block
            pl.BlockSpec((9 * cout_p, cout_p), lambda n: (0, 0)),  # index every step =>
            pl.BlockSpec((1, cout_p), lambda n: (0, 0)),           # no re-DMA)
        ],
        out_specs=pl.BlockSpec((1, Ho, Wo, out_ch), lambda n: (n, 0, 0, 0)),
        scratch_shapes=[
            pltpu.VMEM((Ho + 2, Wo + 2, cin_p), jnp.bfloat16),    # pooled, zero-haloed
            pltpu.VMEM((Ho + 2, Wo + 2, cout_p), jnp.bfloat16),   # conv1 out, zero-haloed
        ],
        compiler_params=pltpu.CompilerParams(
            dimension_semantics=("parallel",),
            vmem_limit_bytes=vmem_limit),
    )(x, w1, t1, w2, t2)

    return jnp.transpose(y, (0, 3, 1, 2))    # NHWC -> NCHW (module semantics: NCHW f32)


# ---------------------------------------------------------------------------
# Pure-JAX reference (f32) for a relaxed-tolerance correctness check
# ---------------------------------------------------------------------------
def down_reference(x_nchw, params):
    ref = params["ref"]
    x = jnp.transpose(x_nchw, (0, 2, 3, 1))
    N, H, W, C = x.shape
    H, W = 2 * (H // 2), 2 * (W // 2)
    x = x[:, :H, :W, :]
    x = x.reshape(N, H // 2, 2, W // 2, 2, C).max(axis=(2, 4))

    def block(x, w, t):
        y = jax.lax.conv_general_dilated(
            x, w, window_strides=(1, 1), padding=((1, 1), (1, 1)),
            dimension_numbers=("NHWC", "HWIO", "NHWC"))
        y = y + t
        return jnp.where(y > 0, y, LEAKY_SLOPE * y)

    y = block(x, ref["w1"], ref["t1"])
    y = block(y, ref["w2"], ref["t2"])
    return jnp.transpose(y, (0, 3, 1, 2))


if __name__ == "__main__":
    key = jax.random.PRNGKey(0)
    kx, kp = jax.random.split(key)

    N, in_ch, H, W = 2, 4, 16, 16
    out_ch = 8
    x = jax.random.normal(kx, (N, in_ch, H, W), jnp.float32)   # PyTorch-style NCHW

    params = init_down_params(kp, in_ch, out_ch)
    y = jax.block_until_ready(down_forward(x, params))

    assert y.shape == (N, out_ch, H // 2, W // 2), y.shape
    assert y.dtype == jnp.float32
    # bf16 matmul operands (f32 accumulation) => relaxed tolerance vs. f32 reference.
    y_ref = down_reference(x, params)
    err = float(jnp.max(jnp.abs(y - y_ref)))
    assert err < 2e-1, f"max abs err vs reference: {err}"
    print("KERNEL_OK")
</pallas_src>

<mosaic_0001>
module attributes {stable_mosaic.version = 11 : i64} {
  func.func @_down_fused_kernel(%arg0: i32, %arg1: memref<1x8x2x8x8xbf16, #tpu.memory_space<vmem>>, %arg2: memref<1152x128xbf16, #tpu.memory_space<vmem>>, %arg3: memref<1x128xf32, #tpu.memory_space<vmem>>, %arg4: memref<1152x128xbf16, #tpu.memory_space<vmem>>, %arg5: memref<1x128xf32, #tpu.memory_space<vmem>>, %arg6: memref<1x8x8x8xf32, #tpu.memory_space<vmem>>, %arg7: memref<10x10x128xbf16, #tpu.memory_space<vmem>>, %arg8: memref<10x10x128xbf16, #tpu.memory_space<vmem>>) attributes {dimension_semantics = [#tpu.dimension_semantics<parallel>], iteration_bounds = array<i64: 2>, scalar_prefetch = 0 : i64, scratch_operands = 2 : i64, tpu.core_type = #tpu.core_type<tc>, window_params = [{transform_indices = @transform_0, window_bounds = array<i64: 1, 8, 2, 8, 8>}, {pipeline_mode = #tpu.pipeline_mode<synchronous>, transform_indices = @transform_1, window_bounds = array<i64: 1152, 128>}, {pipeline_mode = #tpu.pipeline_mode<synchronous>, transform_indices = @transform_2, window_bounds = array<i64: 1, 128>}, {pipeline_mode = #tpu.pipeline_mode<synchronous>, transform_indices = @transform_3, window_bounds = array<i64: 1152, 128>}, {pipeline_mode = #tpu.pipeline_mode<synchronous>, transform_indices = @transform_4, window_bounds = array<i64: 1, 128>}, {transform_indices = @transform_5, window_bounds = array<i64: 1, 8, 8, 8>}]} {
    %c0 = arith.constant 0 : index
    %c0_0 = arith.constant 0 : index
    %c0_1 = arith.constant 0 : index
    %c0_2 = arith.constant 0 : index
    %c0_3 = arith.constant 0 : index
    %0 = vector.load %arg1[%c0, %c0_0, %c0_1, %c0_2, %c0_3] : memref<1x8x2x8x8xbf16, #tpu.memory_space<vmem>>, vector<1x8x1x8x8xbf16>
    %1 = vector.shape_cast %0 : vector<1x8x1x8x8xbf16> to vector<8x8x8xbf16>
    %c0_4 = arith.constant 0 : index
    %c0_5 = arith.constant 0 : index
    %c1 = arith.constant 1 : index
    %c0_6 = arith.constant 0 : index
    %c0_7 = arith.constant 0 : index
    %2 = vector.load %arg1[%c0_4, %c0_5, %c1, %c0_6, %c0_7] : memref<1x8x2x8x8xbf16, #tpu.memory_space<vmem>>, vector<1x8x1x8x8xbf16>
    %3 = vector.shape_cast %2 : vector<1x8x1x8x8xbf16> to vector<8x8x8xbf16>
    %4 = arith.maximumf %1, %3 : vector<8x8x8xbf16>
    %5 = vector.extract_strided_slice %4 {offsets = [0, 0, 0], sizes = [8, 8, 4], strides = [1, 1, 1]} : vector<8x8x8xbf16> to vector<8x8x4xbf16>
    %6 = vector.extract_strided_slice %4 {offsets = [0, 0, 4], sizes = [8, 8, 4], strides = [1, 1, 1]} : vector<8x8x8xbf16> to vector<8x8x4xbf16>
    %7 = arith.maximumf %5, %6 : vector<8x8x4xbf16>
    %cst = arith.constant 0.000000e+00 : bf16
    %8 = vector.broadcast %cst : bf16 to vector<8x8x124xbf16>
    %9 = tpu.concatenate %7, %8 in 2 : vector<8x8x4xbf16>, vector<8x8x124xbf16> -> vector<8x8x128xbf16>
    %cst_8 = arith.constant 0.000000e+00 : bf16
    %10 = vector.broadcast %cst_8 : bf16 to vector<8x1x128xbf16>
    %11 = tpu.concatenate %10, %9, %10 in 1 : vector<8x1x128xbf16>, vector<8x8x128xbf16>, vector<8x1x128xbf16> -> vector<8x10x128xbf16>
    %cst_9 = arith.constant 0.000000e+00 : bf16
    %12 = vector.broadcast %cst_9 : bf16 to vector<1x10x128xbf16>
    %13 = tpu.concatenate %12, %11, %12 in 0 : vector<1x10x128xbf16>, vector<8x10x128xbf16>, vector<1x10x128xbf16> -> vector<10x10x128xbf16>
    %c0_10 = arith.constant 0 : index
    %c0_11 = arith.constant 0 : index
    %c0_12 = arith.constant 0 : index
    %14 = vector.load %arg7[%c0_10, %c0_11, %c0_12] : memref<10x10x128xbf16, #tpu.memory_space<vmem>>, vector<10x10x128xbf16>
    tpu.vector_store %arg7[%c0_10, %c0_11, %c0_12], %13 {strides = array<i32>} : memref<10x10x128xbf16, #tpu.memory_space<vmem>>, vector<10x10x128xbf16>,
    %c0_13 = arith.constant 0 : index
    %c0_14 = arith.constant 0 : index
    %c0_15 = arith.constant 0 : index
    %15 = vector.load %arg7[%c0_13, %c0_14, %c0_15] : memref<10x10x128xbf16, #tpu.memory_space<vmem>>, vector<8x8x128xbf16>
    %c0_16 = arith.constant 0 : index
    %c1_17 = arith.constant 1 : index
    %c0_18 = arith.constant 0 : index
    %16 = vector.load %arg7[%c0_16, %c1_17, %c0_18] : memref<10x10x128xbf16, #tpu.memory_space<vmem>>, vector<8x8x128xbf16>
    %c0_19 = arith.constant 0 : index
    %c2 = arith.constant 2 : index
    %c0_20 = arith.constant 0 : index
    %17 = vector.load %arg7[%c0_19, %c2, %c0_20] : memref<10x10x128xbf16, #tpu.memory_space<vmem>>, vector<8x8x128xbf16>
    %18 = tpu.concatenate %15, %16, %17 in 2 : vector<8x8x128xbf16>, vector<8x8x128xbf16>, vector<8x8x128xbf16> -> vector<8x8x384xbf16>
    %19 = vector.shape_cast %18 : vector<8x8x384xbf16> to vector<64x384xbf16>
    %c0_21 = arith.constant 0 : index
    %c0_22 = arith.constant 0 : index
    %20 = vector.load %arg2[%c0_21, %c0_22] : memref<1152x128xbf16, #tpu.memory_space<vmem>>, vector<384x128xbf16>
    %cst_23 = arith.constant dense<0.000000e+00> : vector<64x128xf32>
    %21 = tpu.matmul %19, %20, %cst_23 {dimension_numbers = #tpu.dot_dimension_numbers<[1], [0], [0], [1], [0, 0, 1, 1], [], []>} : vector<64x384xbf16>, vector<384x128xbf16>, vector<64x128xf32> -> vector<64x128xf32>
    %c1_24 = arith.constant 1 : index
    %c0_25 = arith.constant 0 : index
    %c0_26 = arith.constant 0 : index
    %22 = vector.load %arg7[%c1_24, %c0_25, %c0_26] : memref<10x10x128xbf16, #tpu.memory_space<vmem>>, vector<8x8x128xbf16>
    %c1_27 = arith.constant 1 : index
    %c1_28 = arith.constant 1 : index
    %c0_29 = arith.constant 0 : index
    %23 = vector.load %arg7[%c1_27, %c1_28, %c0_29] : memref<10x10x128xbf16, #tpu.memory_space<vmem>>, vector<8x8x128xbf16>
    %c1_30 = arith.constant 1 : index
    %c2_31 = arith.constant 2 : index
    %c0_32 = arith.constant 0 : index
    %24 = vector.load %arg7[%c1_30, %c2_31, %c0_32] : memref<10x10x128xbf16, #tpu.memory_space<vmem>>, vector<8x8x128xbf16>
    %25 = tpu.concatenate %22, %23, %24 in 2 : vector<8x8x128xbf16>, vector<8x8x128xbf16>, vector<8x8x128xbf16> -> vector<8x8x384xbf16>
    %26 = vector.shape_cast %25 : vector<8x8x384xbf16> to vector<64x384xbf16>
    %c384 = arith.constant 384 : index
    %c0_33 = arith.constant 0 : index
    %27 = vector.load %arg2[%c384, %c0_33] : memref<1152x128xbf16, #tpu.memory_space<vmem>>, vector<384x128xbf16>
    %cst_34 = arith.constant dense<0.000000e+00> : vector<64x128xf32>
    %28 = tpu.matmul %26, %27, %cst_34 {dimension_numbers = #tpu.dot_dimension_numbers<[1], [0], [0], [1], [0, 0, 1, 1], [], []>} : vector<64x384xbf16>, vector<384x128xbf16>, vector<64x128xf32> -> vector<64x128xf32>
    %29 = arith.addf %21, %28 : vector<64x128xf32>
    %c2_35 = arith.constant 2 : index
    %c0_36 = arith.constant 0 : index
    %c0_37 = arith.constant 0 : index
    %30 = vector.load %arg7[%c2_35, %c0_36, %c0_37] : memref<10x10x128xbf16, #tpu.memory_space<vmem>>, vector<8x8x128xbf16>
    %c2_38 = arith.constant 2 : index
    %c1_39 = arith.constant 1 : index
    %c0_40 = arith.constant 0 : index
    %31 = vector.load %arg7[%c2_38, %c1_39, %c0_40] : memref<10x10x128xbf16, #tpu.memory_space<vmem>>, vector<8x8x128xbf16>
    %c2_41 = arith.constant 2 : index
    %c2_42 = arith.constant 2 : index
    %c0_43 = arith.constant 0 : index
    %32 = vector.load %arg7[%c2_41, %c2_42, %c0_43] : memref<10x10x128xbf16, #tpu.memory_space<vmem>>, vector<8x8x128xbf16>
    %33 = tpu.concatenate %30, %31, %32 in 2 : vector<8x8x128xbf16>, vector<8x8x128xbf16>, vector<8x8x128xbf16> -> vector<8x8x384xbf16>
    %34 = vector.shape_cast %33 : vector<8x8x384xbf16> to vector<64x384xbf16>
    %c768 = arith.constant 768 : index
    %c0_44 = arith.constant 0 : index
    %35 = vector.load %arg2[%c768, %c0_44] : memref<1152x128xbf16, #tpu.memory_space<vmem>>, vector<384x128xbf16>
    %cst_45 = arith.constant dense<0.000000e+00> : vector<64x128xf32>
    %36 = tpu.matmul %34, %35, %cst_45 {dimension_numbers = #tpu.dot_dimension_numbers<[1], [0], [0], [1], [0, 0, 1, 1], [], []>} : vector<64x384xbf16>, vector<384x128xbf16>, vector<64x128xf32> -> vector<64x128xf32>
    %37 = arith.addf %29, %36 : vector<64x128xf32>
    %c0_46 = arith.constant 0 : index
    %c0_47 = arith.constant 0 : index
    %38 = vector.load %arg3[%c0_46, %c0_47] : memref<1x128xf32, #tpu.memory_space<vmem>>, vector<1x128xf32>
    %39 = vector.broadcast %38 : vector<1x128xf32> to vector<64x128xf32>
    %40 = arith.addf %37, %39 : vector<64x128xf32>
    %cst_48 = arith.constant 0.000000e+00 : f32
    %41 = vector.broadcast %cst_48 : f32 to vector<64x128xf32>
    %42 = arith.cmpf ogt, %40, %41 : vector<64x128xf32>
    %cst_49 = arith.constant 2.000000e-01 : f32
    %43 = vector.broadcast %cst_49 : f32 to vector<64x128xf32>
    %44 = arith.mulf %43, %40 : vector<64x128xf32>
    %45 = arith.select %42, %40, %44 : vector<64x128xi1>, vector<64x128xf32>
    %46 = vector.shape_cast %45 : vector<64x128xf32> to vector<8x8x128xf32>
    %cst_50 = arith.constant 0.000000e+00 : f32
    %47 = vector.broadcast %cst_50 : f32 to vector<8x1x128xf32>
    %48 = tpu.concatenate %47, %46, %47 in 1 : vector<8x1x128xf32>, vector<8x8x128xf32>, vector<8x1x128xf32> -> vector<8x10x128xf32>
    %cst_51 = arith.constant 0.000000e+00 : f32
    %49 = vector.broadcast %cst_51 : f32 to vector<1x10x128xf32>
    %50 = tpu.concatenate %49, %48, %49 in 0 : vector<1x10x128xf32>, vector<8x10x128xf32>, vector<1x10x128xf32> -> vector<10x10x128xf32>
    %51 = arith.truncf %50 : vector<10x10x128xf32> to vector<10x10x128xbf16>
    %c0_52 = arith.constant 0 : index
    %c0_53 = arith.constant 0 : index
    %c0_54 = arith.constant 0 : index
    %52 = vector.load %arg8[%c0_52, %c0_53, %c0_54] : memref<10x10x128xbf16, #tpu.memory_space<vmem>>, vector<10x10x128xbf16>
    tpu.vector_store %arg8[%c0_52, %c0_53, %c0_54], %51 {strides = array<i32>} : memref<10x10x128xbf16, #tpu.memory_space<vmem>>, vector<10x10x128xbf16>,
    %c0_55 = arith.constant 0 : index
    %c0_56 = arith.constant 0 : index
    %c0_57 = arith.constant 0 : index
    %53 = vector.load %arg8[%c0_55, %c0_56, %c0_57] : memref<10x10x128xbf16, #tpu.memory_space<vmem>>, vector<8x8x128xbf16>
    %c0_58 = arith.constant 0 : index
    %c1_59 = arith.constant 1 : index
    %c0_60 = arith.constant 0 : index
    %54 = vector.load %arg8[%c0_58, %c1_59, %c0_60] : memref<10x10x128xbf16, #tpu.memory_space<vmem>>, vector<8x8x128xbf16>
    %c0_61 = arith.constant 0 : index
    %c2_62 = arith.constant 2 : index
    %c0_63 = arith.constant 0 : index
    %55 = vector.load %arg8[%c0_61, %c2_62, %c0_63] : memref<10x10x128xbf16, #tpu.memory_space<vmem>>, vector<8x8x128xbf16>
    %56 = tpu.concatenate %53, %54, %55 in 2 : vector<8x8x128xbf16>, vector<8x8x128xbf16>, vector<8x8x128xbf16> -> vector<8x8x384xbf16>
    %57 = vector.shape_cast %56 : vector<8x8x384xbf16> to vector<64x384xbf16>
    %c0_64 = arith.constant 0 : index
    %c0_65 = arith.constant 0 : index
    %58 = vector.load %arg4[%c0_64, %c0_65] : memref<1152x128xbf16, #tpu.memory_space<vmem>>, vector<384x128xbf16>
    %cst_66 = arith.constant dense<0.000000e+00> : vector<64x128xf32>
    %59 = tpu.matmul %57, %58, %cst_66 {dimension_numbers = #tpu.dot_dimension_numbers<[1], [0], [0], [1], [0, 0, 1, 1], [], []>} : vector<64x384xbf16>, vector<384x128xbf16>, vector<64x128xf32> -> vector<64x128xf32>
    %c1_67 = arith.constant 1 : index
    %c0_68 = arith.constant 0 : index
    %c0_69 = arith.constant 0 : index
    %60 = vector.load %arg8[%c1_67, %c0_68, %c0_69] : memref<10x10x128xbf16, #tpu.memory_space<vmem>>, vector<8x8x128xbf16>
    %c1_70 = arith.constant 1 : index
    %c1_71 = arith.constant 1 : index
    %c0_72 = arith.constant 0 : index
    %61 = vector.load %arg8[%c1_70, %c1_71, %c0_72] : memref<10x10x128xbf16, #tpu.memory_space<vmem>>, vector<8x8x128xbf16>
    %c1_73 = arith.constant 1 : index
    %c2_74 = arith.constant 2 : index
    %c0_75 = arith.constant 0 : index
    %62 = vector.load %arg8[%c1_73, %c2_74, %c0_75] : memref<10x10x128xbf16, #tpu.memory_space<vmem>>, vector<8x8x128xbf16>
    %63 = tpu.concatenate %60, %61, %62 in 2 : vector<8x8x128xbf16>, vector<8x8x128xbf16>, vector<8x8x128xbf16> -> vector<8x8x384xbf16>
    %64 = vector.shape_cast %63 : vector<8x8x384xbf16> to vector<64x384xbf16>
    %c384_76 = arith.constant 384 : index
    %c0_77 = arith.constant 0 : index
    %65 = vector.load %arg4[%c384_76, %c0_77] : memref<1152x128xbf16, #tpu.memory_space<vmem>>, vector<384x128xbf16>
    %cst_78 = arith.constant dense<0.000000e+00> : vector<64x128xf32>
    %66 = tpu.matmul %64, %65, %cst_78 {dimension_numbers = #tpu.dot_dimension_numbers<[1], [0], [0], [1], [0, 0, 1, 1], [], []>} : vector<64x384xbf16>, vector<384x128xbf16>, vector<64x128xf32> -> vector<64x128xf32>
    %67 = arith.addf %59, %66 : vector<64x128xf32>
    %c2_79 = arith.constant 2 : index
    %c0_80 = arith.constant 0 : index
    %c0_81 = arith.constant 0 : index
    %68 = vector.load %arg8[%c2_79, %c0_80, %c0_81] : memref<10x10x128xbf16, #tpu.memory_space<vmem>>, vector<8x8x128xbf16>
    %c2_82 = arith.constant 2 : index
    %c1_83 = arith.constant 1 : index
    %c0_84 = arith.constant 0 : index
    %69 = vector.load %arg8[%c2_82, %c1_83, %c0_84] : memref<10x10x128xbf16, #tpu.memory_space<vmem>>, vector<8x8x128xbf16>
    %c2_85 = arith.constant 2 : index
    %c2_86 = arith.constant 2 : index
    %c0_87 = arith.constant 0 : index
    %70 = vector.load %arg8[%c2_85, %c2_86, %c0_87] : memref<10x10x128xbf16, #tpu.memory_space<vmem>>, vector<8x8x128xbf16>
    %71 = tpu.concatenate %68, %69, %70 in 2 : vector<8x8x128xbf16>, vector<8x8x128xbf16>, vector<8x8x128xbf16> -> vector<8x8x384xbf16>
    %72 = vector.shape_cast %71 : vector<8x8x384xbf16> to vector<64x384xbf16>
    %c768_88 = arith.constant 768 : index
    %c0_89 = arith.constant 0 : index
    %73 = vector.load %arg4[%c768_88, %c0_89] : memref<1152x128xbf16, #tpu.memory_space<vmem>>, vector<384x128xbf16>
    %cst_90 = arith.constant dense<0.000000e+00> : vector<64x128xf32>
    %74 = tpu.matmul %72, %73, %cst_90 {dimension_numbers = #tpu.dot_dimension_numbers<[1], [0], [0], [1], [0, 0, 1, 1], [], []>} : vector<64x384xbf16>, vector<384x128xbf16>, vector<64x128xf32> -> vector<64x128xf32>
    %75 = arith.addf %67, %74 : vector<64x128xf32>
    %c0_91 = arith.constant 0 : index
    %c0_92 = arith.constant 0 : index
    %76 = vector.load %arg5[%c0_91, %c0_92] : memref<1x128xf32, #tpu.memory_space<vmem>>, vector<1x128xf32>
    %77 = vector.broadcast %76 : vector<1x128xf32> to vector<64x128xf32>
    %78 = arith.addf %75, %77 : vector<64x128xf32>
    %cst_93 = arith.constant 0.000000e+00 : f32
    %79 = vector.broadcast %cst_93 : f32 to vector<64x128xf32>
    %80 = arith.cmpf ogt, %78, %79 : vector<64x128xf32>
    %cst_94 = arith.constant 2.000000e-01 : f32
    %81 = vector.broadcast %cst_94 : f32 to vector<64x128xf32>
    %82 = arith.mulf %81, %78 : vector<64x128xf32>
    %83 = arith.select %80, %78, %82 : vector<64x128xi1>, vector<64x128xf32>
    %84 = vector.shape_cast %83 : vector<64x128xf32> to vector<8x8x128xf32>
    %85 = vector.extract_strided_slice %84 {offsets = [0, 0, 0], sizes = [8, 8, 8], strides = [1, 1, 1]} : vector<8x8x128xf32> to vector<8x8x8xf32>
    %c0_95 = arith.constant 0 : index
    %c0_96 = arith.constant 0 : index
    %c0_97 = arith.constant 0 : index
    %c0_98 = arith.constant 0 : index
    %86 = vector.load %arg6[%c0_95, %c0_96, %c0_97, %c0_98] : memref<1x8x8x8xf32, #tpu.memory_space<vmem>>, vector<1x8x8x8xf32>
    %87 = vector.shape_cast %86 : vector<1x8x8x8xf32> to vector<8x8x8xf32>
    %88 = vector.shape_cast %85 : vector<8x8x8xf32> to vector<1x8x8x8xf32>
    tpu.vector_store %arg6[%c0_95, %c0_96, %c0_97, %c0_98], %88 {strides = array<i32>} : memref<1x8x8x8xf32, #tpu.memory_space<vmem>>, vector<1x8x8x8xf32>,
    return
  }
  func.func @transform_0(%arg0: i32) -> (i32, i32, i32, i32, i32) {
    %c0_i32 = arith.constant 0 : i32
    %c0_i32_0 = arith.constant 0 : i32
    %c0_i32_1 = arith.constant 0 : i32
    %c0_i32_2 = arith.constant 0 : i32
    %c0_i32_3 = arith.constant 0 : i32
    return %arg0, %c0_i32, %c0_i32_0, %c0_i32_1, %c0_i32_2 : i32, i32, i32, i32, i32
  }
  func.func @transform_1(%arg0: i32) -> (i32, i32) {
    %c0_i32 = arith.constant 0 : i32
    %c0_i32_0 = arith.constant 0 : i32
    %c0_i32_1 = arith.constant 0 : i32
    return %c0_i32, %c0_i32_0 : i32, i32
  }
  func.func @transform_2(%arg0: i32) -> (i32, i32) {
    %c0_i32 = arith.constant 0 : i32
    %c0_i32_0 = arith.constant 0 : i32
    %c0_i32_1 = arith.constant 0 : i32
    return %c0_i32, %c0_i32_0 : i32, i32
  }
  func.func @transform_3(%arg0: i32) -> (i32, i32) {
    %c0_i32 = arith.constant 0 : i32
    %c0_i32_0 = arith.constant 0 : i32
    %c0_i32_1 = arith.constant 0 : i32
    return %c0_i32, %c0_i32_0 : i32, i32
  }
  func.func @transform_4(%arg0: i32) -> (i32, i32) {
    %c0_i32 = arith.constant 0 : i32
    %c0_i32_0 = arith.constant 0 : i32
    %c0_i32_1 = arith.constant 0 : i32
    return %c0_i32, %c0_i32_0 : i32, i32
  }
  func.func @transform_5(%arg0: i32) -> (i32, i32, i32, i32) {
    %c0_i32 = arith.constant 0 : i32
    %c0_i32_0 = arith.constant 0 : i32
    %c0_i32_1 = arith.constant 0 : i32
    %c0_i32_2 = arith.constant 0 : i32
    return %arg0, %c0_i32, %c0_i32_0, %c0_i32_1 : i32, i32, i32, i32
  }
}

</mosaic_0001>

<bundles_post_ra>
// kernel: tpu_custom_call.1
= control target key start
LH: loop header
LB: loop body
LE: loop exit
PB: predicated region body
PF: predicated region fallthrough
CT: control target
= control target key end

     0   :  { %10 = vsyncpa [#allocation5], 0  ;;  %s6072_s0 = inlined_call_operand.hbm [shape: bf16[2,8,2,8,8], index: 0, kind: input, shape index: {}]   ;;  %s6073_s1 = inlined_call_operand.hbm [shape: bf16[1152,128], index: 1, kind: input, shape index: {}]   ;;  %s6074_s2 = inlined_call_operand.vmem [shape: f32[1,128], index: 2, kind: input, shape index: {}]   ;;  %s6075_s3 = inlined_call_operand.hbm [shape: bf16[1152,128], index: 3, kind: input, shape index: {}]   ;;  %s6076_s4 = inlined_call_operand.vmem [shape: f32[1,128], index: 4, kind: input, shape index: {}]   ;;  %s6077_s5 = inlined_call_operand.hbm [shape: f32[2,8,8,8], index: 5, kind: output, shape index: {}]  }
   0x1   :  { %12 = vsyncpa [#allocation5 + $0x1], 0 }
   0x2   :  { %13 = vsyncpa [#allocation8], 0 }
   0x3   :  { %14 = vsyncpa [#allocation6], 0 }
   0x4   :  { %16 = vsyncpa [#allocation6 + $0x1], 0  ;;  %s5326_s18 = smov 0   ;;  %s5328_s19 = smov 0  }
   0x5   :  { %s5330_s20 = smov 0   ;;  %s5332_s21 = smov 0  }
   0x6 LB: > { %s5347_s22 = sadd.s32 4294967295, %s5283_s21   ;;  %s3947_s23 = sadd.s32 4294967294, %s5283_s21   ;;  %s5283_s21 = sphi %s5332_s21, %s6111_s21   ;;  %s5279_s20 = sphi %s5330_s20, %s6110_s20   ;;  %s5275_s19 = sphi %s5328_s19, %s6109_s19   ;;  %s5271_s18 = sphi %s5326_s18, %s6108_s18  }
   0x7   : > { %p42_p0 = scmp.ne.s32.totalorder %s5275_s19, %s5271_s18  ;;  %p6078_p1 = scmp.eq.s32.totalorder %s5347_s22, 0 }
   0x8   : > { %p150_p2 = scmp.eq.s32.totalorder %s5347_s22, 1  ;;  %p156_p3 = scmp.eq.s32.totalorder %s3947_s23, 1 }
   0x9   : > { %p5356_p4 = por %p6078_p1, %p42_p0  ;;  %p3948_p5 = scmp.ge.s32.totalorder %s5283_s21, 1 }
   0xa   : > { %p5361_p6 = por %p156_p3, %p42_p0  ;;  %p163_p7 = scmp.lt.s32.totalorder %s5283_s21, 3 }
   0xb   : > { %s6084_s24 = scalar_select %p5356_p4, 1, 0 }
   0xc   : > { %s6085_s25 = scalar_select %p5361_p6, 1, 0 }
   0xd   : > { %p5366_p8 = pnand %p3948_p5, %p163_p7  ;;  %s5285_s27 = smov [#allocation7]  }
   0xe   : > { %s175_s28 = sshll.u32 %s5285_s27, 4  ;;  %s5286_s30 = smov [#allocation9]   ;;  %s176_s28 = int_to_ptr.vmem [resolvable:$true] %s175_s28 }
   0xf   : > { %s6086_s26 = scalar_select %p5366_p8, 1, 0 }
  0x10   : > { %p4809_p9 = pneg %p5366_p8  ;;  %s191_s6 = sshll.u32 %s5286_s30, 4  ;;  %s192_s6 = int_to_ptr.vmem [resolvable:$true] %s191_s6 }
  0x11   : > { %s5146_s7 = scalar_lea.vmem %s176_s28, 9216  ;;  %p5154_p5 = scmp.lt.s32.totalorder %s176_s28, %s176_s28 }
  0x12   : > { %p5375_p11 = pnand %p4809_p9, %p6078_p1  ;;  %p5147_p13 = scmp.ne.s32.totalorder %s176_s28, %s5146_s7 }
  0x13   : > { %p5155_p7 = scmp.lt.s32.totalorder %s5146_s7, %s5146_s7 }
  0x14   : > { %p5137_p12 = pneg %p5375_p11 }
  0x15   : > { %p5156_p10 = por %p5155_p7, %p5154_p5 }
  0x16   : > { %p5149_p0 = pnand %p5147_p13, %p5137_p12 }
  0x18   : > { %p5150_p3 = pneg %p5149_p0 }
  0x1a   : > { %p5157_p9 = pnand %p5156_p10, %p5150_p3 }
  0x1c   : > { %5160 = shalt.err (!%p5157_p9)
}
  0x1d   : > { %s6079_s8 = smov 64   ;;  %s5288_s9 = smov 4  }
  0x1e   : > { %4812 = dma.hbm_to_vmem [thread:$0]  (!%p5375_p11), %s6073_s1, 9216, %s176_s28, [#allocation8], %s6079_s8, %s6079_s8, %s5288_s9  }
  0x1f   : > { %s5172_s12 = scalar_lea.vmem %s192_s6, 9216  ;;  %p5180_p10 = scmp.lt.s32.totalorder %s192_s6, %s192_s6 }
  0x20   : > { %p5173_p13 = scmp.ne.s32.totalorder %s192_s6, %s5172_s12  ;;  %p5181_p3 = scmp.lt.s32.totalorder %s5172_s12, %s5172_s12 }
  0x22   : > { %p5175_p0 = pnand %p5173_p13, %p5137_p12  ;;  %p5182_p7 = por %p5181_p3, %p5180_p10 }
  0x24   : > { %p5176_p5 = pneg %p5175_p0 }
  0x26   : > { %p5183_p9 = pnand %p5182_p7, %p5176_p5 }
  0x28   : > { %5186 = shalt.err (!%p5183_p9)
}
  0x29   : > { %4815 = dma.hbm_to_vmem [thread:$0]  (!%p5375_p11), %s6075_s3, 9216, %s192_s6, [#allocation8], %s6079_s8, %s6079_s8, %s5288_s9  }
  0x2a   : > { %s5404_s15 = sadd.s32 1, %s5283_s21   ;;  %s29_s16 = sadd.s32 1, %s5279_s20 }
  0x2b   : > { %s26_s17 = ssub.s32 %s5283_s21, %s5404_s15  ;;  %p36_p12 = scmp.ne.s32.totalorder %s5279_s20, %s5275_s19 }
  0x2c   : > { %p27_p13 = scmp.eq.s32.totalorder %s26_s17, 0  ;;  %p37_p0 = scmp.eq.s32.totalorder %s5283_s21, 0 }
  0x2d   : > { %p5414_p5 = por %p150_p2, %p36_p12  ;;  %p4826_p10 = scmp.lt.s32.totalorder %s5283_s21, 2 }
  0x2e   : > { %s5420_s27 = scalar_select %p27_p13, %s5279_s20, %s29_s16  }
  0x2f   : > { %s6088_s23 = scalar_select %p5414_p5, 1, 0 }
  0x30   : > { %p38_p3 = por %p37_p0, %p36_p12  ;;  %s208_s28 = sand.u32 1, %s5279_s20  }
  0x31   : > { %s3952_s29 = sshll.u32 %s208_s28, 6  ;;  %s4323_s30 = sshll.u32 %s5283_s21, 10 }
  0x32   : > { %s5427_s10 = scalar_lea.hbm %s6072_s0, %s4323_s30  ;;  %s212_s11 = scalar_lea.vmem [#allocation4], %s3952_s29 }
  0x33   : > { %s219_s12 = sshll.u32 %s212_s11, 4  ;;  %p5431_p2 = pnand %p4826_p10, %p38_p3  ;;  %s5429_s12 = int_to_ptr.vmem [resolvable:$true] %s219_s12 }
  0x34   : > { %s5435_s14 = scalar_lea.sflag [#allocation5], %s208_s28  ;;  %s5187_s16 = scalar_lea.hbm %s5427_s10, 1024 }
  0x35   : > { %p5188_p11 = scmp.ne.s32.totalorder %s5427_s10, %s5187_s16  ;;  %p5189_p7 = pneg %p5431_p2 }
  0x36   : > { %s5192_s29 = scalar_lea.hbm %s6072_s0, 2048  ;;  %p5193_p13 = scmp.lt.s32.totalorder %s5427_s10, %s6072_s0 }
  0x37   : > { %p5190_p9 = pnand %p5189_p7, %p5188_p11  ;;  %p5194_p0 = scmp.lt.s32.totalorder %s5192_s29, %s5187_s16 }
  0x39   : > { %p5191_p12 = pneg %p5190_p9  ;;  %p5195_p10 = por %p5194_p0, %p5193_p13 }
  0x3b   : > { %p5196_p3 = pnand %p5195_p10, %p5191_p12 }
  0x3d   : > { %5199 = shalt.err (!%p5196_p3)
}
  0x3e   : > { %s5200_s28 = scalar_lea.vmem %s5429_s12, 1024  ;;  %s5289_s11 = smov [#allocation4]  }
  0x3f   : > { %p5201_p1 = scmp.ne.s32.totalorder %s5429_s12, %s5200_s28  ;;  %s5205_s8 = sshll.u32 %s5289_s11, 4  ;;  %s5206_s8 = int_to_ptr.vmem [resolvable:$false] %s5205_s8 }
  0x40   : > { %s5207_s17 = scalar_lea.vmem %s5206_s8, 2048  ;;  %p5208_p9 = scmp.lt.s32.totalorder %s5429_s12, %s5206_s8 }
  0x41   : > { %p5203_p6 = pnand %p5201_p1, %p5189_p7  ;;  %p5209_p5 = scmp.lt.s32.totalorder %s5207_s17, %s5200_s28 }
  0x43   : > { %p5204_p11 = pneg %p5203_p6  ;;  %p5210_p4 = por %p5209_p5, %p5208_p9 }
  0x45   : > { %p5211_p8 = pnand %p5210_p4, %p5204_p11 }
  0x47   : > { %5214 = shalt.err (!%p5211_p8)
}
  0x48   : > { %s6090_s16 = smov 64   ;;  %p6091_p1 = scmp.ne.s32.totalorder %s6086_s26, 0 }
  0x49   : > { %4819 = dma.hbm_to_vmem [thread:$0]  (!%p5431_p2), %s5427_s10, 1024, %s5429_s12, %s5435_s14, %s6090_s16, %s6090_s16, %s5288_s9  }
  0x4a   : > { %231 = sbr.rel (%p6091_p1) target bundleno = 862 (0x35e), region = 40 }
  0x4f   : > { %s5462_s30 = sand.u32 1, %s5275_s19   ;;  %p6092_p4 = scmp.ne.s32.totalorder %s6084_s24, 0 }
  0x50   : > { %s3956_s8 = sshll.u32 %s5462_s30, 6  ;;  %s234_s29 = scalar_lea.sflag [#allocation5], %s5462_s30 }
  0x51   : > { %s237_s13 = scalar_lea.vmem [#allocation4], %s3956_s8 }
  0x52   : > { %5258 = dma.done.wait (%p6092_p4), %s234_s29, 1024  }
  0x53   : > { %5260 = vsyncadd (%p6092_p4), %s234_s29, 4294966272  ;;  %p6093_p6 = scmp.eq.s32.totalorder %s5347_s22, 0 }
  0x55   : > { %5262 = dma.done.wait (%p6093_p6), [#allocation8], 18432   ;;  %p6094_p8 = pmov %p6093_p6 }
  0x56   : > { %v275_v0 = vld [vmem:[%s237_s13 + $0x10] sm:$0xf]  ;;  %v3962_v1 = vld [vmem:[%s237_s13 + $0x14] sm:$0xf]  ;;  %v273_v2 = vld [vmem:[%s237_s13] sm:$0xf] }
  0x57   : > { %5264 = vsyncadd (%p6094_p8), [#allocation8], 4294948864  ;;  %v5476_v3 = vmax.bf16 %v3962_v1, %v275_v0  ;;  %v3960_v4 = vld [vmem:[%s237_s13 + $0x4] sm:$0xf]  ;;  %v276_v5 = vld [vmem:[%s237_s13 + $0x18] sm:$0xf] }
  0x58   : > { %v3963_v6 = vld [vmem:[%s237_s13 + $0x1c] sm:$0xf]  ;;  %v5478_v7 = vmax.bf16 %v3960_v4, %v273_v2  ;;  %v274_v8 = vld [vmem:[%s237_s13 + $0x8] sm:$0xf]  ;;  %v3961_v9 = vld [vmem:[%s237_s13 + $0xc] sm:$0xf] }
  0x59   : > { %s5290_s24 = smov 124   ;;  %v5482_v10 = vmax.bf16 %v3963_v6, %v276_v5  ;;  %v5486_v11 = vmax.bf16 %v3961_v9, %v274_v8  ;;  %v277_v12 = vld [vmem:[%s237_s13 + $0x20] sm:$0xf]  ;;  %v278_v13 = vld [vmem:[%s237_s13 + $0x28] sm:$0xf]  ;;  %v4871_v18 = vld [vmem:[#allocation7 + $0x178] sm:$0xff]  }
  0x5a   : > { %310 = vrot.lane.b32.xlu1 %v5476_v3, %s5290_s24  ;;  %306 = vrot.lane.b32.xlu0 %v5478_v7, %s5290_s24  ;;  %v3965_v14 = vld [vmem:[%s237_s13 + $0x2c] sm:$0xf]  ;;  %v3964_v15 = vld [vmem:[%s237_s13 + $0x24] sm:$0xf]  ;;  %v4872_v22 = vld [vmem:[#allocation7 + $0x138] sm:$0xff]   ;;  %v5291_v23 = vmov 0  }
  0x5b   : > { %v280_v16 = vld [vmem:[%s237_s13 + $0x38] sm:$0xf]  ;;  %v3967_v17 = vld [vmem:[%s237_s13 + $0x3c] sm:$0xf]  ;;  %v5490_v19 = vmax.bf16 %v3965_v14, %v278_v13  ;;  %v279_v20 = vld [vmem:[%s237_s13 + $0x30] sm:$0xf]  ;;  %v3968_v24 = vcombine.low %v5291_v23, %v5291_v23  ;;  %v3969_v25 = vcombine.high %v5291_v23, %v5291_v23  ;;  %v5494_v26 = vmax.bf16 %v3964_v15, %v277_v12  ;;  %4653 = vmatprep.subr.bf16.mxu1 %v4871_v18 }
  0x5c   : > { %v3966_v21 = vld [vmem:[%s237_s13 + $0x34] sm:$0xf]  ;;  %4654 = vmatpush3.bf16.msra.mxu1 %v4871_v18  ;;  %4341 = vmatprep.subr.bf16.mxu0 %v4872_v22  ;;  %v4874_v28 = vld [vmem:[#allocation7 + $0xf8] sm:$0xff]   ;;  %v5498_v30 = vmax.bf16 %v3967_v17, %v280_v16  ;;  %v4876_v31 = vld [vmem:[#allocation7 + $0x168] sm:$0xff]   ;;  %vm338_vm0 = vcmask 31744   ;;  %vm412_vm3 = vcmask 1040384  }
  0x5d   : > { %v4873_v27 = vld [vmem:[#allocation7 + $0x170] sm:$0xff]   ;;  %497 = vst [vmem:[#allocation2] sm:$0xf] %v3968_v24  ;;  %498 = vst [vmem:[#allocation2 + $0x4] sm:$0x1] %v3969_v25  ;;  %4342 = vmatpush3.bf16.msra.mxu0 %v4874_v28  ;;  %v5502_v32 = vmax.bf16 %v3966_v21, %v279_v20  ;;  %v4878_v34 = vld [vmem:[#allocation7 + $0x128] sm:$0xff]  }
  0x5e   : > { %312 = vrot.lane.b32.xlu1 %v5482_v10, %s5290_s24  ;;  %308 = vrot.lane.b32.xlu0 %v5486_v11, %s5290_s24  ;;  %515 = vst [vmem:[#allocation2 + $0x48] sm:$0xf] %v3968_v24  ;;  %516 = vst [vmem:[#allocation2 + $0x4c] sm:$0x1] %v3969_v25  ;;  %v4875_v29 = vld [vmem:[#allocation7 + $0x130] sm:$0xff]   ;;  %v4879_v35 = vld [vmem:[#allocation7 + $0x160] sm:$0xff]  }
  0x5f   : > { %4655 = vmatprep.subr.bf16.mxu1 %v4873_v27  ;;  %4343 = vmatprep.subr.bf16.mxu0 %v4875_v29  ;;  %v4877_v33 = vld [vmem:[#allocation7 + $0xf0] sm:$0xff]   ;;  %v4880_v36 = vld [vmem:[#allocation7 + $0xe8] sm:$0xff]   ;;  %v4881_v37 = vld [vmem:[#allocation7 + $0x120] sm:$0xff]   ;;  %vm413_vm1 = vsmask.f32 256  ;;  %vm423_vm4 = vcmask 1044480  }
  0x60   : > { %4656 = vmatpush3.bf16.msra.mxu1 %v4873_v27  ;;  %v4882_v38 = vld [vmem:[#allocation7 + $0x158] sm:$0xff]   ;;  %v4883_v39 = vld [vmem:[#allocation7 + $0xe0] sm:$0xff]   ;;  %v4885_v41 = vld [vmem:[#allocation7 + $0x150] sm:$0xff]   ;;  %vm424_vm2 = vsmask.f32 4352  ;;  %vm3832_vm15 = vcmask 64512  }
  0x61   : > { %4657 = vmatprep.subr.bf16.mxu1 %v4876_v31  ;;  %4344 = vmatpush3.bf16.msra.mxu0 %v4877_v33  ;;  %v4884_v40 = vld [vmem:[#allocation7 + $0x118] sm:$0xff]   ;;  %v4887_v43 = vld [vmem:[#allocation7 + $0x110] sm:$0xff]   ;;  %v4888_v44 = vld [vmem:[#allocation7 + $0x148] sm:$0xff]   ;;  %s5979_s14 = scalar_lea.vmem [#allocation10], %s3956_s8  ;;  %s4340_s6 = sshll.u32 %s5347_s22, 10 }
  0x62   : > { %316 = vrot.lane.b32.xlu1 %v5490_v19, %s5290_s24  ;;  %314 = vrot.lane.b32.xlu0 %v5494_v26, %s5290_s24  ;;  %v4886_v42 = vld [vmem:[#allocation7 + $0xd8] sm:$0xff]   ;;  %v4889_v45 = vld [vmem:[#allocation7 + $0xd0] sm:$0xff]   ;;  %v4890_v46 = vld [vmem:[#allocation7 + $0x108] sm:$0xff]   ;;  %s3855_s7 = sshll.u32 %s5979_s14, 4  ;;  %s6025_s17 = scalar_lea.hbm %s6077_s5, %s4340_s6  ;;  %s6027_s7 = int_to_ptr.vmem [resolvable:$true] %s3855_s7 }
  0x63   : > { %4345 = vmatprep.subr.bf16.mxu0 %v4878_v34  ;;  %v4891_v47 = vld [vmem:[#allocation7 + $0x140] sm:$0xff]   ;;  %v4892_v48 = vld [vmem:[#allocation7 + $0xc8] sm:$0xff]   ;;  %v5508_v50 = vld [vmem:[#allocation7 + $0xb8] sm:$0xff]   ;;  %s3842_s22 = scalar_lea.sflag [#allocation6], %s5462_s30  ;;  %s5215_s16 = scalar_lea.vmem %s6027_s7, 1024 }
  0x64   : > { %4658 = vmatpush3.bf16.msra.mxu1 %v4876_v31  ;;  %v4893_v49 = vld [vmem:[#allocation7 + $0x100] sm:$0xff]   ;;  %v4904_v52 = vld [vmem:[#allocation7 + $0x78] sm:$0xff]   ;;  %vm5520_vm5 = vmand %vm412_vm3, %vm413_vm1  ;;  %p5216_p5 = scmp.ne.s32.totalorder %s6027_s7, %s5215_s16  ;;  %p6105_p2 = scmp.ne.s32.totalorder %s6088_s23, 0 }
  0x65   : > { %4659 = vmatprep.subr.bf16.mxu1 %v4879_v35  ;;  %4346 = vmatpush3.bf16.msra.mxu0 %v4880_v36  ;;  %v4899_v51 = vld [vmem:[#allocation7 + $0xc0] sm:$0xff]   ;;  %vm5527_vm6 = vmand %vm423_vm4, %vm424_vm2  ;;  %v4905_v13 = vld [vmem:[#allocation7 + $0xb0] sm:$0xff]   ;;  %s5293_s8 = smov [#allocation10]  }
  0x66   : > { %320 = vrot.lane.b32.xlu1 %v5498_v30, %s5290_s24  ;;  %318 = vrot.lane.b32.xlu0 %v5502_v32, %s5290_s24  ;;  %p5217_p7 = pnand %p5216_p5, %p6105_p2  ;;  %s5219_s29 = sshll.u32 %s5293_s8, 4  ;;  %s5220_s29 = int_to_ptr.vmem [resolvable:$false] %s5219_s29 }
  0x67   : > { %4347 = vmatprep.subr.bf16.mxu0 %v4881_v37  ;;  %s5221_s13 = scalar_lea.vmem %s5220_s29, 2048  ;;  %p5222_p13 = scmp.lt.s32.totalorder %s6027_s7, %s5220_s29 }
  0x68   : > { %4660 = vmatpush3.bf16.msra.mxu1 %v4879_v35  ;;  %p5218_p12 = pneg %p5217_p7  ;;  %p5223_p0 = scmp.lt.s32.totalorder %s5221_s13, %s5215_s16 }
  0x69   : > { %4661 = vmatprep.subr.bf16.mxu1 %v4882_v38  ;;  %4348 = vmatpush3.bf16.msra.mxu0 %v4883_v39 }
  0x6a   : > { %4349 = vmatprep.subr.bf16.mxu0 %v4884_v40  ;;  %p5224_p10 = por %p5223_p0, %p5222_p13 }
  0x6c   : > { %4662 = vmatpush3.bf16.msra.mxu1 %v4882_v38  ;;  %p5225_p3 = pnand %p5224_p10, %p5218_p12 }
  0x6d   : > { %4663 = vmatprep.subr.bf16.mxu1 %v4885_v41  ;;  %4350 = vmatpush3.bf16.msra.mxu0 %v4886_v42 }
  0x6e   : > { %4351 = vmatprep.subr.bf16.mxu0 %v4887_v43 }
  0x70   : > { %4664 = vmatpush3.bf16.msra.mxu1 %v4885_v41 }
  0x71   : > { %4665 = vmatprep.subr.bf16.mxu1 %v4888_v44  ;;  %4352 = vmatpush3.bf16.msra.mxu0 %v4889_v45 }
  0x72   : > { %4353 = vmatprep.subr.bf16.mxu0 %v4890_v46 }
  0x74   : > { %4666 = vmatpush3.bf16.msra.mxu1 %v4888_v44 }
  0x75   : > { %4667 = vmatprep.subr.bf16.mxu1 %v4891_v47  ;;  %4354 = vmatpush3.bf16.msra.mxu0 %v4892_v48 }
  0x76   : > { %4355 = vmatprep.subr.bf16.mxu0 %v4893_v49 }
  0x78   : > { %4668 = vmatpush3.bf16.msra.mxu1 %v4891_v47 }
  0x79   : > { %4677 = vmatprep.subr.bf16.mxu1 %v5508_v50  ;;  %4356 = vmatpush3.bf16.msra.mxu0 %v4899_v51 }
  0x7a   : > { %4393 = vmatprep.subr.bf16.mxu0 %v4904_v52 }
  0xcc   : > { %v311_v53 = vpop.permute.xlu1 %310  ;;  %v307_v55 = vpop.permute.xlu0 %306 }
  0xcd   : > { %v332_v54 = vmax.bf16 %v311_v53, %v5476_v3  ;;  %v330_v56 = vmax.bf16 %v307_v55, %v5478_v7 }
  0xcf   : > { %v345_v57 = vsel %vm338_vm0, %v332_v54, 0  ;;  %v341_v60 = vsel %vm338_vm0, %v330_v56, 0 }
  0xd0   : > { %v368_v58 = vshrl.u32 %v345_v57, 16  ;;  %v371_v59 = vshll.u32 %v345_v57, 16  ;;  %v313_v61 = vpop.permute.xlu1 %312  ;;  %v356_v62 = vshrl.u32 %v341_v60, 16  ;;  %v309_v0 = vpop.permute.xlu0 %308  ;;  %v359_v2 = vshll.u32 %v341_v60, 16 }
  0xd1   : > { %v333_v63 = vmax.bf16 %v313_v61, %v5482_v10  ;;  %v331_v3 = vmax.bf16 %v309_v0, %v5486_v11 }
  0xd2   : > { %v370_v1 = vrot.slane %v368_v58, 7  ;;  %v358_v4 = vrot.slane %v356_v62, 7 }
  0xd3   : > { %v347_v5 = vsel %vm338_vm0, %v333_v63, 0  ;;  %v343_v12 = vsel %vm338_vm0, %v331_v3, 0 }
  0xd4   : > { %v373_v7 = vor.u32 %v371_v59, %v370_v1  ;;  %v374_v8 = vshrl.u32 %v347_v5, 16  ;;  %v377_v9 = vshll.u32 %v347_v5, 16  ;;  %v317_v10 = vpop.permute.xlu1 %316  ;;  %v361_v11 = vor.u32 %v359_v2, %v358_v4  ;;  %v315_v16 = vpop.permute.xlu0 %314  ;;  %v5565_v2 = vld [vmem:[#allocation2] sm:$0xe] }
  0xd5   : > { %v362_v14 = vshrl.u32 %v343_v12, 16  ;;  %v365_v15 = vshll.u32 %v343_v12, 16  ;;  %v335_v17 = vmax.bf16 %v317_v10, %v5490_v19  ;;  %v334_v21 = vmax.bf16 %v315_v16, %v5494_v26 }
  0xd6   : > { %v417_v18 = vsel %vm5520_vm5, 0, %v373_v7  ;;  %v376_v20 = vrot.slane %v374_v8, 7  ;;  %v415_v23 = vsel %vm5520_vm5, 0, %v361_v11 }
  0xd7   : > { %v428_v22 = vsel %vm5527_vm6, %v417_v18, 0  ;;  %v364_v24 = vrot.slane %v362_v14, 7  ;;  %v351_v25 = vsel %vm338_vm0, %v335_v17, 0  ;;  %v426_v19 = vsel %vm5527_vm6, %v415_v23, 0 }
  0xd8   : > { %v3974_v27 = vcombine.low %v428_v22, %v428_v22  ;;  %v3975_v28 = vcombine.high %v428_v22, %v428_v22  ;;  %v379_v29 = vor.u32 %v377_v9, %v376_v20  ;;  %v321_v31 = vpop.permute.xlu1 %320  ;;  %v3970_v33 = vcombine.low %v426_v19, %v426_v19  ;;  %v319_v44 = vpop.permute.xlu0 %318 }
  0xd9   : > { %v3971_v34 = vcombine.high %v426_v19, %v426_v19  ;;  %v367_v35 = vor.u32 %v365_v15, %v364_v24  ;;  %v349_v26 = vsel %vm338_vm0, %v334_v21, 0  ;;  %v386_v39 = vshrl.u32 %v351_v25, 16 }
  0xda   : > { %503 = vst [vmem:[#allocation2 + $0x18] sm:$0xf] %v3974_v27  ;;  %504 = vst [vmem:[#allocation2 + $0x1c] sm:$0x1] %v3975_v28  ;;  %v418_v36 = vsel %vm5520_vm5, 0, %v379_v29  ;;  %v380_v37 = vshrl.u32 %v349_v26, 16  ;;  %v337_v43 = vmax.bf16 %v321_v31, %v5498_v30  ;;  %v336_v57 = vmax.bf16 %v319_v44, %v5502_v32 }
  0xdb   : > { %v383_v38 = vshll.u32 %v349_v26, 16  ;;  %499 = vst [vmem:[#allocation2 + $0x8] sm:$0xf] %v3970_v33  ;;  %500 = vst [vmem:[#allocation2 + $0xc] sm:$0x1] %v3971_v34  ;;  %v429_v40 = vsel %vm5527_vm6, %v418_v36, 0 }
  0xdc   : > { %v416_v41 = vsel %vm5520_vm5, 0, %v367_v35  ;;  %v389_v42 = vshll.u32 %v351_v25, 16  ;;  %v3976_v45 = vcombine.low %v429_v40, %v429_v40  ;;  %v3977_v46 = vcombine.high %v429_v40, %v429_v40  ;;  %v5563_v32 = vld [vmem:[#allocation2 + $0x4] sm:$0x1] }
  0xdd   : > { %v427_v47 = vsel %vm5527_vm6, %v416_v41, 0  ;;  %v382_v48 = vrot.slane %v380_v37, 7  ;;  %v388_v52 = vrot.slane %v386_v39, 7  ;;  %v355_v53 = vsel %vm338_vm0, %v337_v43, 0 }
  0xde   : > { %v3972_v49 = vcombine.low %v427_v47, %v427_v47  ;;  %v3973_v51 = vcombine.high %v427_v47, %v427_v47  ;;  %505 = vst [vmem:[#allocation2 + $0x20] sm:$0xf] %v3976_v45  ;;  %506 = vst [vmem:[#allocation2 + $0x24] sm:$0x1] %v3977_v46  ;;  %v398_v55 = vshrl.u32 %v355_v53, 16  ;;  %v401_v56 = vshll.u32 %v355_v53, 16 }
  0xdf   : > { %v385_v54 = vor.u32 %v383_v38, %v382_v48  ;;  %v391_v30 = vor.u32 %v389_v42, %v388_v52  ;;  %v353_v60 = vsel %vm338_vm0, %v336_v57, 0  ;;  %v3994_v35 = vcombine.low %v5565_v2, %v5563_v32 }
  0xe0   : > { %501 = vst [vmem:[#allocation2 + $0x10] sm:$0xf] %v3972_v49  ;;  %502 = vst [vmem:[#allocation2 + $0x14] sm:$0x1] %v3973_v51  ;;  %v400_v59 = vrot.slane %v398_v55, 7  ;;  %v392_v63 = vshrl.u32 %v353_v60, 16 }
  0xe1   : > { %v419_v58 = vsel %vm5520_vm5, 0, %v385_v54  ;;  %v420_v62 = vsel %vm5520_vm5, 0, %v391_v30  ;;  %v395_v0 = vshll.u32 %v353_v60, 16  ;;  %v5561_v1 = vld [vmem:[#allocation2 + $0x18] sm:$0xf] }
  0xe2   : > { %v430_v61 = vsel %vm5527_vm6, %v419_v58, 0  ;;  %v431_v5 = vsel %vm5527_vm6, %v420_v62, 0  ;;  %v403_v7 = vor.u32 %v401_v56, %v400_v59  ;;  %v5569_v8 = vld [vmem:[#allocation2 + $0x8] sm:$0xf]  ;;  %v742_v9 = vld [vmem:[#allocation2 + $0xc] sm:$0x1] }
  0xe3   : > { %v3978_v3 = vcombine.low %v430_v61, %v430_v61  ;;  %v3979_v4 = vcombine.high %v430_v61, %v430_v61  ;;  %v3980_v12 = vcombine.low %v431_v5, %v431_v5  ;;  %v3981_v10 = vcombine.high %v431_v5, %v431_v5  ;;  %v750_v14 = vld [vmem:[#allocation2 + $0x8] sm:$0xe]  ;;  %v744_v16 = vld [vmem:[#allocation2 + $0x1c] sm:$0x1]  ;;  %v752_v20 = vld [vmem:[#allocation2 + $0x18] sm:$0xe] }
  0xe4   : > { %v394_v11 = vrot.slane %v392_v63, 7  ;;  %v5572_v15 = vcombine.low %v5569_v8, %v742_v9  ;;  %v422_v17 = vsel %vm5520_vm5, 0, %v403_v7  ;;  %v4010_v18 = vcombine.low %v750_v14, %v742_v9  ;;  %v5593_v47 = vld [vmem:[#allocation2 + $0xc] sm:$0x1]  ;;  %v534_v53 = vld [vmem:[#allocation2 + $0x8] sm:$0xe] }
  0xe5   : > { %507 = vst [vmem:[#allocation2 + $0x28] sm:$0xf] %v3978_v3  ;;  %508 = vst [vmem:[#allocation2 + $0x2c] sm:$0x1] %v3979_v4  ;;  %v433_v21 = vsel %vm5527_vm6, %v422_v17, 0  ;;  %v4012_v25 = vcombine.low %v752_v20, %v744_v16  ;;  %v4004_v34 = vcombine.low %v5561_v1, %v744_v16  ;;  %v3995_v3 = vcombine.low %v534_v53, %v5593_v47 }
  0xe6   : > { %509 = vst [vmem:[#allocation2 + $0x30] sm:$0xf] %v3980_v12  ;;  %510 = vst [vmem:[#allocation2 + $0x34] sm:$0x1] %v3981_v10  ;;  %v397_v22 = vor.u32 %v395_v0, %v394_v11  ;;  %v5578_v23 = vld [vmem:[#allocation2 + $0x20] sm:$0xf]  ;;  %v3984_v28 = vcombine.low %v433_v21, %v433_v21  ;;  %v3985_v19 = vcombine.high %v433_v21, %v433_v21 }
  0xe7   : > { %v745_v24 = vld [vmem:[#allocation2 + $0x24] sm:$0x1]  ;;  %v799_v27 = vshrl.u32 %v5572_v15, 16  ;;  %v5581_v29 = vld [vmem:[#allocation2 + $0x10] sm:$0xf]  ;;  %v880_v42 = vrot.slane %v4012_v25, 1 }
  0xe8   : > { %v743_v31 = vld [vmem:[#allocation2 + $0x14] sm:$0x1]  ;;  %v751_v33 = vld [vmem:[#allocation2 + $0x10] sm:$0xe]  ;;  %v421_v26 = vsel %vm5520_vm5, 0, %v397_v22  ;;  %v4005_v39 = vcombine.low %v5578_v23, %v745_v24  ;;  %v801_v43 = vshll.u32 %v5572_v15, 16 }
  0xe9   : > { %v4003_v36 = vcombine.low %v5581_v29, %v743_v31  ;;  %v4011_v37 = vcombine.low %v751_v33, %v743_v31  ;;  %v753_v38 = vld [vmem:[#allocation2 + $0x20] sm:$0xe]  ;;  %513 = vst [vmem:[#allocation2 + $0x40] sm:$0xf] %v3984_v28  ;;  %514 = vst [vmem:[#allocation2 + $0x44] sm:$0x1] %v3985_v19 }
  0xea   : > { %v432_v40 = vsel %vm5527_vm6, %v421_v26, 0  ;;  %v4013_v41 = vcombine.low %v753_v38, %v745_v24  ;;  %v878_v46 = vrot.slane %v4010_v18, 1  ;;  %v803_v49 = vrot.slane %v801_v43, 1  ;;  %v4907_v21 = vld [vmem:[#allocation7 + $0x38] sm:$0xff]   ;;  %v4913_v19 = vld [vmem:[#allocation7 + $0xa8] sm:$0xff]  }
  0xeb   : > { %v3982_v44 = vcombine.low %v432_v40, %v432_v40  ;;  %v3983_v45 = vcombine.high %v432_v40, %v432_v40  ;;  %v879_v6 = vrot.slane %v4011_v37, 1  ;;  %v806_v51 = vshrl.u32 %v4003_v36, 16 }
  0xec   : > { %v881_v48 = vrot.slane %v4013_v41, 1  ;;  %v808_v52 = vshll.u32 %v4003_v36, 16  ;;  %v813_v55 = vshrl.u32 %v4004_v34, 16  ;;  %v815_v56 = vshll.u32 %v4004_v34, 16  ;;  %v5595_v30 = vld [vmem:[#allocation2 + $0x28] sm:$0xf] }
  0xed   : > { %511 = vst [vmem:[#allocation2 + $0x38] sm:$0xf] %v3982_v44  ;;  %512 = vst [vmem:[#allocation2 + $0x3c] sm:$0x1] %v3983_v45  ;;  %v4020_v54 = vcombine.low %v878_v46, %v879_v6  ;;  %v820_v57 = vshrl.u32 %v4005_v39, 16  ;;  %v822_v60 = vshll.u32 %v4005_v39, 16  ;;  %v804_v5 = vor.u32 %v803_v49, %v799_v27 }
  0xee   : > { %v4023_v58 = vcombine.low %v880_v42, %v881_v48  ;;  %v810_v59 = vrot.slane %v808_v52, 1  ;;  %v5597_v61 = vld [vmem:[#allocation2 + $0x30] sm:$0xf]  ;;  %v746_v62 = vld [vmem:[#allocation2 + $0x2c] sm:$0x1]  ;;  %v817_v63 = vrot.slane %v815_v56, 1  ;;  %v4018_v27 = vcombine.low %v5569_v8, %v5581_v29 }
  0xef   : > { %4669 = vmatprep.mubr.bf16.mxu1 %v4020_v54  ;;  %v747_v0 = vld [vmem:[#allocation2 + $0x34] sm:$0x1]  ;;  %v754_v2 = vld [vmem:[#allocation2 + $0x28] sm:$0xe]  ;;  %v5600_v4 = vrot.slane %v3994_v35, 1  ;;  %v824_v9 = vrot.slane %v822_v60, 1  ;;  %v4006_v14 = vcombine.low %v5595_v30, %v746_v62 }
  0xf0   : > { %4670 = vmatmul.mubr.bf16.vlgmr.msra.gmra.mxu1 %v4023_v58  ;;  %v811_v7 = vor.u32 %v810_v59, %v806_v51  ;;  %v755_v12 = vld [vmem:[#allocation2 + $0x30] sm:$0xe]  ;;  %v4014_v10 = vcombine.low %v754_v2, %v746_v62  ;;  %v818_v11 = vor.u32 %v817_v63, %v813_v55  ;;  %v5604_v16 = vld [vmem:[#allocation2 + $0x40] sm:$0xf]  ;;  %v749_v17 = vld [vmem:[#allocation2 + $0x44] sm:$0x1]  ;;  %v4007_v24 = vcombine.low %v5597_v61, %v747_v0 }
  0xf1   : > { %4678 = vmatpush3.bf16.msra.mxu1 %v5508_v50  ;;  %v4015_v15 = vcombine.low %v755_v12, %v747_v0  ;;  %v757_v18 = vld [vmem:[#allocation2 + $0x40] sm:$0xe]  ;;  %v825_v22 = vor.u32 %v824_v9, %v820_v57  ;;  %v4912_v50 = vld [vmem:[#allocation7 + $0x70] sm:$0xff]   ;;  %v662_v33 = vrot.slane %v3995_v3, 1  ;;  %v4009_v37 = vcombine.low %v5604_v16, %v749_v17  ;;  %v4924_v6 = vld [vmem:[#allocation7 + $0x68] sm:$0xff]  }
  0xf2   : > { %v4019_v20 = vcombine.low %v804_v5, %v811_v7  ;;  %4679 = vmatprep.subr.bf16.mxu1 %v4905_v13  ;;  %v882_v25 = vrot.slane %v4014_v10, 1  ;;  %v4017_v31 = vcombine.low %v757_v18, %v749_v17  ;;  %v4918_v29 = vld [vmem:[#allocation7 + $0x30] sm:$0xff]   ;;  %v4925_v41 = vld [vmem:[#allocation7 + $0xa0] sm:$0xff]   ;;  %v827_v42 = vshrl.u32 %v4006_v14, 16  ;;  %v4927_v58 = vld [vmem:[#allocation7 + $0x28] sm:$0xff]  }
  0xf3   : > { %v883_v28 = vrot.slane %v4015_v15, 1  ;;  %v4022_v34 = vcombine.low %v818_v11, %v825_v22  ;;  %v829_v43 = vshll.u32 %v4006_v14, 16  ;;  %v834_v44 = vshrl.u32 %v4007_v24, 16  ;;  %v5613_v54 = vld [vmem:[#allocation2] sm:$0xf]  ;;  %v4929_v3 = vld [vmem:[#allocation7 + $0x98] sm:$0xff]  }
  0xf4   : > { %1150 = vmatprep.mubr.bf16.mxu0 %v4019_v20  ;;  %v5609_v35 = vld [vmem:[#allocation2 + $0x38] sm:$0xf]  ;;  %v748_v26 = vld [vmem:[#allocation2 + $0x3c] sm:$0x1]  ;;  %v885_v8 = vrot.slane %v4017_v31, 1  ;;  %v836_v45 = vshll.u32 %v4007_v24, 16  ;;  %v4056_v55 = vcombine.low %v5600_v4, %v662_v33  ;;  %v4021_v0 = vcombine.low %v5561_v1, %v5578_v23 }
  0xf5   : > { %v756_v36 = vld [vmem:[#allocation2 + $0x38] sm:$0xe]  ;;  %1151 = vmatmul.mubr.bf16.vlgmr.msra.gmra.mxu0 %v4018_v27  ;;  %4680 = vmatpush3.bf16.msra.mxu1 %v4905_v13  ;;  %v4026_v38 = vcombine.low %v882_v25, %v883_v28  ;;  %v4008_v39 = vcombine.low %v5609_v35, %v748_v26  ;;  %v831_v49 = vrot.slane %v829_v43, 1  ;;  %v850_v52 = vshll.u32 %v4009_v37, 16  ;;  %v5615_v13 = vld [vmem:[#allocation2 + $0x8] sm:$0xf] }
  0xf6   : > { %v4016_v40 = vcombine.low %v756_v36, %v748_v26  ;;  %4394 = vmatpush3.bf16.msra.mxu0 %v4907_v21  ;;  %1158 = vmatprep.mubr.bf16.mxu0 %v4022_v34  ;;  %v838_v51 = vrot.slane %v836_v45, 1  ;;  %v848_v57 = vshrl.u32 %v4009_v37, 16  ;;  %v4928_v2 = vld [vmem:[#allocation7 + $0x60] sm:$0xff]   ;;  %v3986_v5 = vcombine.low %v5613_v54, %v5563_v32  ;;  %v4932_v12 = vld [vmem:[#allocation7 + $0x90] sm:$0xff]   ;;  %v4931_v1 = vld [vmem:[#allocation7 + $0x58] sm:$0xff]  }
  0xf7   : > { %4673 = vmatprep.mubr.bf16.mxu1 %v4026_v38  ;;  %4395 = vmatprep.subr.bf16.mxu0 %v4912_v50  ;;  %v843_v48 = vshll.u32 %v4008_v39, 16  ;;  %v841_v56 = vshrl.u32 %v4008_v39, 16  ;;  %v832_v59 = vor.u32 %v831_v49, %v827_v42  ;;  %v852_v63 = vrot.slane %v850_v52, 1  ;;  %v4930_v9 = vld [vmem:[#allocation7 + $0x20] sm:$0xff]   ;;  %v527_v15 = vld [vmem:[#allocation2 + $0x14] sm:$0x1] }
  0xf8   : > { %v884_v46 = vrot.slane %v4016_v40, 1  ;;  %4681 = vmatprep.subr.bf16.mxu1 %v4913_v19  ;;  %v839_v60 = vor.u32 %v838_v51, %v834_v44  ;;  %v3987_v4 = vcombine.low %v5615_v13, %v5593_v47  ;;  %v584_v23 = vshll.u32 %v3986_v5, 16  ;;  %v528_v32 = vld [vmem:[#allocation2 + $0x1c] sm:$0x1]  ;;  %v5624_v17 = vld [vmem:[#allocation2 + $0x10] sm:$0xf] }
  0xf9   : > { %4682 = vmatpush3.bf16.msra.mxu1 %v4913_v19  ;;  %v845_v62 = vrot.slane %v843_v48, 1  ;;  %v853_v11 = vor.u32 %v852_v63, %v848_v57  ;;  %v5626_v47 = vld [vmem:[#allocation2 + $0x18] sm:$0xf]  ;;  %v535_v21 = vld [vmem:[#allocation2 + $0x10] sm:$0xe]  ;;  %v4024_v24 = vcombine.low %v5595_v30, %v5597_v61  ;;  %v4936_v27 = vld [vmem:[#allocation7 + $0x88] sm:$0xff]   ;;  %v5631_v34 = vcombine.low %v5624_v17, %v527_v15 }
  0xfa   : > { %v4029_v53 = vcombine.low %v884_v46, %v885_v8  ;;  %4396 = vmatpush3.bf16.msra.mxu0 %v4918_v29  ;;  %4683 = vmatprep.subr.bf16.mxu1 %v4925_v41  ;;  %v4025_v7 = vcombine.low %v832_v59, %v839_v60  ;;  %v591_v14 = vshll.u32 %v3987_v4, 16  ;;  %v4934_v18 = vld [vmem:[#allocation7 + $0x18] sm:$0xff]   ;;  %v4935_v25 = vld [vmem:[#allocation7 + $0x50] sm:$0xff]   ;;  %v582_v28 = vshrl.u32 %v3986_v5, 16  ;;  %v537_v31 = vld [vmem:[#allocation2 + $0x20] sm:$0xe] }
  0xfb   : > { %4397 = vmatprep.subr.bf16.mxu0 %v4924_v6  ;;  %v846_v10 = vor.u32 %v845_v62, %v841_v56  ;;  %v536_v22 = vld [vmem:[#allocation2 + $0x18] sm:$0xe]  ;;  %v586_v50 = vrot.slane %v584_v23, 1  ;;  %v538_v33 = vld [vmem:[#allocation2 + $0x28] sm:$0xe]  ;;  %v5634_v26 = vcombine.low %v5626_v47, %v528_v32  ;;  %v4937_v36 = vld [vmem:[#allocation7 + $0x10] sm:$0xff]   ;;  %v3996_v37 = vcombine.low %v535_v21, %v527_v15 }
  0xfc   : > { %4674 = vmatmul.mubr.bf16.gmra.mxu1 %v4029_v53  ;;  %v593_v19 = vrot.slane %v591_v14, 1  ;;  %v3997_v38 = vcombine.low %v536_v22, %v528_v32  ;;  %v4939_v30 = vld [vmem:[#allocation7 + $0x80] sm:$0xff]   ;;  %v589_v61 = vshrl.u32 %v3987_v4, 16  ;;  %v530_v40 = vld [vmem:[#allocation2 + $0x2c] sm:$0x1]  ;;  %v598_v46 = vshll.u32 %v5631_v34, 16 }
  0xfd   : > { %4693 = vmatprep.mubr.bf16.mxu1 %v4056_v55  ;;  %1159 = vmatmul.mubr.bf16.gmra.mxu0 %v4021_v0  ;;  %v4028_v20 = vcombine.low %v846_v10, %v853_v11  ;;  %v529_v39 = vld [vmem:[#allocation2 + $0x24] sm:$0x1]  ;;  %v4938_v8 = vld [vmem:[#allocation7 + $0x48] sm:$0xff]   ;;  %v5636_v29 = vld [vmem:[#allocation2 + $0x20] sm:$0xf]  ;;  %v3999_v42 = vcombine.low %v538_v33, %v530_v40  ;;  %v587_v43 = vor.u32 %v586_v50, %v582_v28  ;;  %v605_v6 = vshll.u32 %v5634_v26, 16 }
  0xfe   : > { %4684 = vmatpush3.bf16.msra.mxu1 %v4925_v41  ;;  %4398 = vmatpush3.bf16.msra.mxu0 %v4927_v58  ;;  %v3998_v41 = vcombine.low %v537_v31, %v529_v39  ;;  %v594_v44 = vor.u32 %v593_v19, %v589_v61  ;;  %v5638_v45 = vld [vmem:[#allocation2 + $0x28] sm:$0xf]  ;;  %v4942_v49 = vld [vmem:[#allocation7 + $0x40] sm:$0xff]   ;;  %v663_v51 = vrot.slane %v3996_v37, 1  ;;  %v664_v52 = vrot.slane %v3997_v38, 1  ;;  %v4945_v53 = vld [vmem:[#allocation7 + $0x238] sm:$0xff]  }
  0xff   : > { %1166 = vmatprep.mubr.bf16.mxu0 %v4025_v7  ;;  %4399 = vmatprep.subr.bf16.mxu0 %v4928_v2  ;;  %v4941_v48 = vld [vmem:[#allocation7 + $0x8] sm:$0xff]   ;;  %v5643_v55 = vcombine.low %v5636_v29, %v529_v39  ;;  %v539_v56 = vld [vmem:[#allocation2 + $0x30] sm:$0xe]  ;;  %v540_v57 = vld [vmem:[#allocation2 + $0x38] sm:$0xe]  ;;  %v4027_v59 = vcombine.low %v5609_v35, %v5604_v16  ;;  %v5650_v60 = vcombine.low %v5638_v45, %v530_v40  ;;  %v666_v63 = vrot.slane %v3999_v42, 1 }
 0x100   : > { %4685 = vmatprep.subr.bf16.mxu1 %v4929_v3  ;;  %v5645_v58 = vld [vmem:[#allocation2 + $0x14] sm:$0x1]  ;;  %v665_v62 = vrot.slane %v3998_v41, 1  ;;  %v5652_v0 = vld [vmem:[#allocation2 + $0x1c] sm:$0x1]  ;;  %v600_v5 = vrot.slane %v598_v46, 1  ;;  %v4059_v16 = vcombine.low %v663_v51, %v664_v52  ;;  %v4054_v50 = vcombine.low %v5613_v54, %v5615_v13 }
 0x101   : > { %v1563_v2 = vld [vmem:[#allocation2 + $0x10] sm:$0xe]  ;;  %v603_v4 = vshrl.u32 %v5634_v26, 16  ;;  %v607_v7 = vrot.slane %v605_v6, 1  ;;  %v532_v10 = vld [vmem:[#allocation2 + $0x3c] sm:$0x1] }
 0x102   : > { %4686 = vmatpush3.bf16.msra.mxu1 %v4929_v3  ;;  %4400 = vmatpush3.bf16.msra.mxu0 %v4930_v9  ;;  %v4055_v3 = vcombine.low %v587_v43, %v594_v44  ;;  %v1564_v9 = vld [vmem:[#allocation2 + $0x18] sm:$0xe]  ;;  %v4946_v35 = vld [vmem:[#allocation7] sm:$0xff]   ;;  %v4952_v11 = vld [vmem:[#allocation7 + $0x230] sm:$0xff]   ;;  %v4001_v14 = vcombine.low %v540_v57, %v532_v10  ;;  %v4062_v15 = vcombine.low %v665_v62, %v666_v63  ;;  %v619_v28 = vshll.u32 %v5650_v60, 16 }
 0x103   : > { %4687 = vmatprep.subr.bf16.mxu1 %v4932_v12  ;;  %4401 = vmatprep.subr.bf16.mxu0 %v4931_v1  ;;  %v596_v1 = vshrl.u32 %v5631_v34, 16  ;;  %v4951_v32 = vld [vmem:[#allocation7 + $0x1f8] sm:$0xff]   ;;  %v4099_v21 = vcombine.low %v1564_v9, %v5652_v0  ;;  %v4961_v37 = vld [vmem:[#allocation7 + $0x228] sm:$0xff]   ;;  %v610_v61 = vshrl.u32 %v5643_v55, 16  ;;  %v617_v54 = vshrl.u32 %v5650_v60, 16  ;;  %v4962_v41 = vld [vmem:[#allocation7 + $0x1b0] sm:$0xff]  }
 0x104   : > { %v4953_v19 = vld [vmem:[#allocation7 + $0x1b8] sm:$0xff]   ;;  %v668_v34 = vrot.slane %v4001_v14, 1  ;;  %v621_v13 = vrot.slane %v619_v28, 1  ;;  %v4969_v42 = vld [vmem:[#allocation7 + $0x220] sm:$0xff]   ;;  %v5670_v43 = vld [vmem:[#allocation2 + $0x10] sm:$0xf]  ;;  %v4057_v57 = vcombine.low %v5624_v17, %v5626_v47 }
 0x105   : > { %1167 = vmatmul.mubr.bf16.gmra.mxu0 %v4024_v24  ;;  %v601_v22 = vor.u32 %v600_v5, %v596_v1  ;;  %v608_v24 = vor.u32 %v607_v7, %v603_v4  ;;  %v4968_v46 = vld [vmem:[#allocation7 + $0x1e8] sm:$0xff]   ;;  %v5672_v6 = vld [vmem:[#allocation2 + $0x18] sm:$0xf]  ;;  %v4976_v4 = vld [vmem:[#allocation7 + $0x210] sm:$0xff]  }
 0x106   : > { %4688 = vmatpush3.bf16.msra.mxu1 %v4932_v12  ;;  %4402 = vmatpush3.bf16.msra.mxu0 %v4934_v18  ;;  %v531_v12 = vld [vmem:[#allocation2 + $0x34] sm:$0x1]  ;;  %v5656_v18 = vld [vmem:[#allocation2 + $0x30] sm:$0xf]  ;;  %v4973_v60 = vld [vmem:[#allocation7 + $0x218] sm:$0xff]  }
 0x107   : > { %1174 = vmatprep.mubr.bf16.mxu0 %v4028_v20  ;;  %4403 = vmatprep.subr.bf16.mxu0 %v4935_v25  ;;  %v4000_v23 = vcombine.low %v539_v56, %v531_v12  ;;  %v4098_v20 = vcombine.low %v1563_v2, %v5645_v58  ;;  %v5660_v25 = vld [vmem:[#allocation2 + $0x38] sm:$0xf]  ;;  %v3992_v31 = vcombine.low %v5656_v18, %v531_v12  ;;  %v1557_v47 = vld [vmem:[#allocation2 + $0x24] sm:$0x1]  ;;  %v4979_v1 = vld [vmem:[#allocation7 + $0x1d0] sm:$0xff]  }
 0x108   : > { %4689 = vmatprep.subr.bf16.mxu1 %v4936_v27  ;;  %v3993_v26 = vcombine.low %v5660_v25, %v532_v10  ;;  %v4058_v39 = vcombine.low %v601_v22, %v608_v24  ;;  %v4091_v56 = vcombine.low %v5672_v6, %v5652_v0  ;;  %v4975_v0 = vld [vmem:[#allocation7 + $0x1d8] sm:$0xff]   ;;  %v1558_v10 = vld [vmem:[#allocation2 + $0x2c] sm:$0x1]  ;;  %v1566_v22 = vld [vmem:[#allocation2 + $0x28] sm:$0xe] }
 0x109   : > { %v667_v33 = vrot.slane %v4000_v23, 1  ;;  %v1691_v38 = vrot.slane %v4098_v20, 1  ;;  %v626_v51 = vshll.u32 %v3992_v31, 16  ;;  %v624_v62 = vshrl.u32 %v3992_v31, 16  ;;  %v4980_v23 = vld [vmem:[#allocation7 + $0x208] sm:$0xff]  }
 0x10a   : > { %4690 = vmatpush3.bf16.msra.mxu1 %v4936_v27  ;;  %4404 = vmatpush3.bf16.msra.mxu0 %v4937_v36  ;;  %v612_v27 = vshll.u32 %v5643_v55, 16  ;;  %v4960_v36 = vld [vmem:[#allocation7 + $0x1f0] sm:$0xff]   ;;  %v633_v52 = vshll.u32 %v3993_v26, 16  ;;  %v4971_v55 = vld [vmem:[#allocation7 + $0x1a8] sm:$0xff]   ;;  %v1621_v9 = vshll.u32 %v4091_v56, 16 }
 0x10b   : > { %4691 = vmatprep.subr.bf16.mxu1 %v4939_v30  ;;  %4405 = vmatprep.subr.bf16.mxu0 %v4938_v8  ;;  %v4065_v8 = vcombine.low %v667_v33, %v668_v34  ;;  %v628_v2 = vrot.slane %v626_v51, 1  ;;  %v1567_v28 = vld [vmem:[#allocation2 + $0x30] sm:$0xe]  ;;  %v4983_v34 = vld [vmem:[#allocation7 + $0x200] sm:$0xff]  }
 0x10c   : > { %v614_v40 = vrot.slane %v612_v27, 1  ;;  %v635_v5 = vrot.slane %v633_v52, 1  ;;  %v1623_v20 = vrot.slane %v1621_v9, 1  ;;  %v4981_v33 = vld [vmem:[#allocation7 + $0x190] sm:$0xff]   ;;  %v4986_v52 = vld [vmem:[#allocation7 + $0x1c0] sm:$0xff]  }
 0x10d   : > { %1175 = vmatmul.mubr.bf16.gmra.mxu0 %v4027_v59  ;;  %v4972_v59 = vld [vmem:[#allocation7 + $0x1e0] sm:$0xff]   ;;  %v629_v12 = vor.u32 %v628_v2, %v624_v62 }
 0x10e   : > { %4692 = vmatpush3.bf16.msra.mxu1 %v4939_v30  ;;  %4406 = vmatpush3.bf16.msra.mxu0 %v4941_v48  ;;  %v1692_v30 = vrot.slane %v4099_v21, 1  ;;  %v615_v48 = vor.u32 %v614_v40, %v610_v61  ;;  %v1565_v21 = vld [vmem:[#allocation2 + $0x20] sm:$0xe]  ;;  %v5688_v61 = vld [vmem:[#allocation2 + $0x30] sm:$0xf] }
 0x10f   : > { %1448 = vmatprep.mubr.bf16.mxu0 %v4055_v3  ;;  %4407 = vmatprep.subr.bf16.mxu0 %v4942_v49  ;;  %v622_v49 = vor.u32 %v621_v13, %v617_v54  ;;  %v631_v3 = vshrl.u32 %v3993_v26, 16  ;;  %v5690_v54 = vld [vmem:[#allocation2 + $0x38] sm:$0xf]  ;;  %v1553_v9 = vld [vmem:[#allocation2 + $0x40] sm:$0xf] }
 0x110   : > { %4701 = vmatprep.subr.bf16.mxu1 %v4945_v53  ;;  %v4108_v44 = vcombine.low %v1691_v38, %v1692_v30  ;;  %v4982_v38 = vld [vmem:[#allocation7 + $0x1c8] sm:$0xff]  }
 0x111   : > { %4694 = vmatmul.mubr.bf16.vlgmr.msra.gmra.mxu1 %v4059_v16  ;;  %v4061_v63 = vcombine.low %v615_v48, %v622_v49  ;;  %v636_v17 = vor.u32 %v635_v5, %v631_v3  ;;  %v5680_v16 = vld [vmem:[#allocation2 + $0x20] sm:$0xf]  ;;  %v1570_v49 = vld [vmem:[#allocation2 + $0x48] sm:$0xe] }
 0x112   : > { %4697 = vmatprep.mubr.bf16.mxu1 %v4062_v15  ;;  %4702 = vmatpush3.bf16.msra.mxu1 %v4945_v53  ;;  %v4090_v53 = vcombine.low %v5670_v43, %v5645_v58  ;;  %v4974_v58 = vld [vmem:[#allocation7 + $0x1a0] sm:$0xff]   ;;  %v4060_v15 = vcombine.low %v5636_v29, %v5638_v45  ;;  %v4100_v29 = vcombine.low %v1565_v21, %v1557_v47 }
 0x113   : > { %4408 = vmatpush3.bf16.msra.mxu0 %v4946_v35  ;;  %4703 = vmatprep.subr.bf16.mxu1 %v4952_v11  ;;  %v5682_v35 = vld [vmem:[#allocation2 + $0x28] sm:$0xf]  ;;  %v4064_v24 = vcombine.low %v629_v12, %v636_v17  ;;  %v4101_v45 = vcombine.low %v1566_v22, %v1558_v10  ;;  %v4989_v3 = vld [vmem:[#allocation7 + $0x180] sm:$0xff]  }
 0x114   : > { %4445 = vmatprep.subr.bf16.mxu0 %v4951_v32  ;;  %v1614_v7 = vshll.u32 %v4090_v53, 16  ;;  %v1619_v32 = vshrl.u32 %v4091_v56, 16  ;;  %v1612_v27 = vshrl.u32 %v4090_v53, 16  ;;  %v4093_v31 = vcombine.low %v5682_v35, %v1558_v10  ;;  %v1554_v12 = vld [vmem:[#allocation2 + $0x48] sm:$0xf] }
 0x116   : > { %1449 = vmatmul.mubr.bf16.vlgmr.msra.gmra.mxu0 %v4054_v50  ;;  %4704 = vmatpush3.bf16.msra.mxu1 %v4952_v11  ;;  %v4978_v11 = vld [vmem:[#allocation7 + $0x198] sm:$0xff]   ;;  %v1616_v14 = vrot.slane %v1614_v7, 1  ;;  %v1624_v30 = vor.u32 %v1623_v20, %v1619_v32  ;;  %v1633_v62 = vshrl.u32 %v4093_v31, 16 }
 0x117   : > { %4446 = vmatpush3.bf16.msra.mxu0 %v4953_v19  ;;  %1456 = vmatprep.mubr.bf16.mxu0 %v4058_v39  ;;  %v1568_v50 = vld [vmem:[#allocation2 + $0x38] sm:$0xe]  ;;  %v4092_v19 = vcombine.low %v5680_v16, %v1557_v47 }
 0x118   : > { %4447 = vmatprep.subr.bf16.mxu0 %v4960_v36  ;;  %4705 = vmatprep.subr.bf16.mxu1 %v4961_v37  ;;  %v1617_v26 = vor.u32 %v1616_v14, %v1612_v27  ;;  %v1559_v36 = vld [vmem:[#allocation2 + $0x34] sm:$0x1] }
 0x119   : > { %4698 = vmatmul.mubr.bf16.gmra.mxu1 %v4065_v8  ;;  %v4102_v39 = vcombine.low %v1567_v28, %v1559_v36  ;;  %v1628_v13 = vshll.u32 %v4092_v19, 16  ;;  %v1635_v8 = vshll.u32 %v4093_v31, 16  ;;  %v4094_v48 = vcombine.low %v5688_v61, %v1559_v36 }
 0x11a   : > { %4706 = vmatpush3.bf16.msra.mxu1 %v4961_v37  ;;  %4717 = vmatprep.mubr.bf16.mxu1 %v4108_v44  ;;  %v1560_v37 = vld [vmem:[#allocation2 + $0x3c] sm:$0x1]  ;;  %v1693_v44 = vrot.slane %v4100_v29, 1  ;;  %v4107_v51 = vcombine.low %v1617_v26, %v1624_v30  ;;  %v4109_v31 = vcombine.low %v5680_v16, %v5682_v35  ;;  %v4112_v36 = vcombine.low %v5688_v61, %v5690_v54  ;;  %v5010_v61 = vld [vmem:[#allocation9 + $0xe8] sm:$0xff]  }
 0x11b   : > { %4448 = vmatpush3.bf16.msra.mxu0 %v4962_v41  ;;  %4707 = vmatprep.subr.bf16.mxu1 %v4969_v42  ;;  %v4103_v40 = vcombine.low %v1568_v50, %v1560_v37  ;;  %v4063_v41 = vcombine.low %v5656_v18, %v5660_v25  ;;  %v4095_v53 = vcombine.low %v5690_v54, %v1560_v37  ;;  %v1561_v18 = vld [vmem:[#allocation2 + $0x44] sm:$0x1]  ;;  %v1562_v25 = vld [vmem:[#allocation2 + $0x4c] sm:$0x1]  ;;  %v1642_v17 = vshll.u32 %v4094_v48, 16  ;;  %v5003_v30 = vld [vmem:[#allocation9 + $0x138] sm:$0xff]  }
 0x11c   : > { %4449 = vmatprep.subr.bf16.mxu0 %v4968_v46  ;;  %v1694_v46 = vrot.slane %v4101_v45, 1  ;;  %v4097_v14 = vcombine.low %v1554_v12, %v1562_v25  ;;  %v5004_v16 = vld [vmem:[#allocation9 + $0xf8] sm:$0xff]   ;;  %v5011_v54 = vld [vmem:[#allocation9 + $0x168] sm:$0xff]  }
 0x11d   : > { %v1696_v56 = vrot.slane %v4103_v40, 1  ;;  %v1649_v47 = vshll.u32 %v4095_v53, 16  ;;  %v1644_v20 = vrot.slane %v1642_v17, 1  ;;  %v1647_v21 = vshrl.u32 %v4095_v53, 16  ;;  %v5005_v35 = vld [vmem:[#allocation9 + $0x178] sm:$0xff]   ;;  %v5007_v40 = vld [vmem:[#allocation9 + $0xf0] sm:$0xff]  }
 0x11e   : > { %1457 = vmatmul.mubr.bf16.gmra.mxu0 %v4057_v57  ;;  %4708 = vmatpush3.bf16.msra.mxu1 %v4969_v42  ;;  %v4985_v42 = vld [vmem:[#allocation7 + $0x188] sm:$0xff]   ;;  %v1569_v57 = vld [vmem:[#allocation2 + $0x40] sm:$0xe]  ;;  %v4111_v2 = vcombine.low %v1693_v44, %v1694_v46  ;;  %v5015_v46 = vld [vmem:[#allocation9 + $0x118] sm:$0xff]  }
 0x11f   : > { %4450 = vmatpush3.bf16.msra.mxu0 %v4971_v55  ;;  %1464 = vmatprep.mubr.bf16.mxu0 %v4061_v63  ;;  %v1695_v55 = vrot.slane %v4102_v39, 1  ;;  %v1637_v63 = vrot.slane %v1635_v8, 1  ;;  %v4104_v5 = vcombine.low %v1569_v57, %v1561_v18  ;;  %v1651_v22 = vrot.slane %v1649_v47, 1  ;;  %v5006_v39 = vld [vmem:[#allocation9 + $0x130] sm:$0xff]   ;;  %v5009_v8 = vld [vmem:[#allocation9 + $0x128] sm:$0xff]   ;;  %v5014_v44 = vld [vmem:[#allocation9 + $0x160] sm:$0xff]  }
 0x120   : > { %4451 = vmatprep.subr.bf16.mxu0 %v4972_v59  ;;  %4709 = vmatprep.subr.bf16.mxu1 %v4973_v60  ;;  %v1626_v59 = vshrl.u32 %v4092_v19, 16  ;;  %v1663_v19 = vshll.u32 %v4097_v14, 16  ;;  %v5020_v53 = vld [vmem:[#allocation9 + $0x150] sm:$0xff]   ;;  %v5022_v57 = vld [vmem:[#allocation9 + $0xc8] sm:$0xff]  }
 0x121   : > { %v1697_v10 = vrot.slane %v4104_v5, 1  ;;  %v1652_v28 = vor.u32 %v1651_v22, %v1647_v21 }
 0x122   : > { %4710 = vmatpush3.bf16.msra.mxu1 %v4973_v60  ;;  %v1630_v60 = vrot.slane %v1628_v13, 1  ;;  %v1665_v26 = vrot.slane %v1663_v19, 1  ;;  %v5008_v13 = vld [vmem:[#allocation9 + $0x170] sm:$0xff]  }
 0x123   : > { %4452 = vmatpush3.bf16.msra.mxu0 %v4974_v58  ;;  %4711 = vmatprep.subr.bf16.mxu1 %v4976_v4  ;;  %v4105_v58 = vcombine.low %v1570_v49, %v1562_v25  ;;  %v5017_v49 = vld [vmem:[#allocation9 + $0x158] sm:$0xff]   ;;  %v5030_v25 = vld [vmem:[#allocation9 + $0xc0] sm:$0xff]  }
 0x124   : > { %4453 = vmatprep.subr.bf16.mxu0 %v4975_v0  ;;  %v1631_v7 = vor.u32 %v1630_v60, %v1626_v59  ;;  %v1638_v0 = vor.u32 %v1637_v63, %v1633_v62  ;;  %v5024_v59 = vld [vmem:[#allocation9 + $0x100] sm:$0xff]   ;;  %v5292_v60 = vmov 0.0|0.0  }
 0x125   : > { %v4143_v62 = vcombine.low %v5292_v60, %v5292_v60  ;;  %v4144_v63 = vcombine.high %v5292_v60, %v5292_v60 }
 0x126   : > { %1465 = vmatmul.mubr.bf16.gmra.mxu0 %v4060_v15  ;;  %4712 = vmatpush3.bf16.msra.mxu1 %v4976_v4  ;;  %v4114_v4 = vcombine.low %v1695_v55, %v1696_v56  ;;  %v1640_v15 = vshrl.u32 %v4094_v48, 16  ;;  %v4110_v32 = vcombine.low %v1631_v7, %v1638_v0  ;;  %v5016_v48 = vld [vmem:[#allocation9 + $0xd8] sm:$0xff]   ;;  %v5021_v55 = vld [vmem:[#allocation9 + $0x108] sm:$0xff]  }
 0x127   : > { %4454 = vmatpush3.bf16.msra.mxu0 %v4978_v11  ;;  %1472 = vmatprep.mubr.bf16.mxu0 %v4064_v24  ;;  %v1698_v11 = vrot.slane %v4105_v58, 1  ;;  %v5023_v56 = vld [vmem:[#allocation9 + $0x148] sm:$0xff]   ;;  %2221 = vst [vmem:[#allocation3] sm:$0xf] %v4143_v62  ;;  %2222 = vst [vmem:[#allocation3 + $0x4] sm:$0x1] %v4144_v63 }
 0x128   : > { %4455 = vmatprep.subr.bf16.mxu0 %v4979_v1  ;;  %4713 = vmatprep.subr.bf16.mxu1 %v4980_v23  ;;  %v4106_v1 = vcombine.low %v5670_v43, %v5672_v6  ;;  %v1645_v27 = vor.u32 %v1644_v20, %v1640_v15  ;;  %2239 = vst [vmem:[#allocation3 + $0x48] sm:$0xf] %v4143_v62  ;;  %2240 = vst [vmem:[#allocation3 + $0x4c] sm:$0x1] %v4144_v63 }
 0x129   : > { %v4117_v24 = vcombine.low %v1697_v10, %v1698_v11 }
 0x12a   : > { %4714 = vmatpush3.bf16.msra.mxu1 %v4980_v23  ;;  %v4096_v23 = vcombine.low %v1553_v9, %v1561_v18  ;;  %v4113_v43 = vcombine.low %v1645_v27, %v1652_v28  ;;  %v5031_v18 = vld [vmem:[#allocation9 + $0x140] sm:$0xff]  }
 0x12b   : > { %4456 = vmatpush3.bf16.msra.mxu0 %v4981_v33  ;;  %4715 = vmatprep.subr.bf16.mxu1 %v4983_v34  ;;  %v1661_v33 = vshrl.u32 %v4097_v14, 16 }
 0x12c   : > { %4457 = vmatprep.subr.bf16.mxu0 %v4982_v38  ;;  %v1656_v50 = vshll.u32 %v4096_v23, 16  ;;  %v1654_v6 = vshrl.u32 %v4096_v23, 16  ;;  %v4115_v38 = vcombine.low %v1553_v9, %v1554_v12 }
 0x12d   : > { %v1666_v45 = vor.u32 %v1665_v26, %v1661_v33 }
 0x12e   : > { %1473 = vmatmul.mubr.bf16.gmra.mxu0 %v4063_v41  ;;  %4716 = vmatpush3.bf16.msra.mxu1 %v4983_v34  ;;  %v1658_v34 = vrot.slane %v1656_v50, 1  ;;  %v5012_v41 = vld [vmem:[#allocation9 + $0x120] sm:$0xff]  }
 0x12f   : > { %4458 = vmatpush3.bf16.msra.mxu0 %v4985_v42  ;;  %1963 = vmatprep.mubr.bf16.mxu0 %v4107_v51  ;;  %v5013_v42 = vld [vmem:[#allocation9 + $0xe0] sm:$0xff]   ;;  %v5018_v51 = vld [vmem:[#allocation9 + $0x110] sm:$0xff]  }
 0x130   : > { %4459 = vmatprep.subr.bf16.mxu0 %v4986_v52  ;;  %v1659_v29 = vor.u32 %v1658_v34, %v1654_v6  ;;  %4725 = vmatprep.subr.bf16.mxu1 %v5005_v35  ;;  %v5019_v52 = vld [vmem:[#allocation9 + $0xd0] sm:$0xff]  }
 0x131   : > { %4718 = vmatmul.mubr.bf16.vlgmr.msra.gmra.mxu1 %v4111_v2  ;;  %v5032_v2 = vld [vmem:[#allocation9 + $0x78] sm:$0xff]  }
 0x132   : > { %4721 = vmatprep.mubr.bf16.mxu1 %v4114_v4  ;;  %v4116_v37 = vcombine.low %v1659_v29, %v1666_v45  ;;  %4726 = vmatpush3.bf16.msra.mxu1 %v5005_v35 }
 0x133   : > { %4460 = vmatpush3.bf16.msra.mxu0 %v4989_v3  ;;  %4727 = vmatprep.subr.bf16.mxu1 %v5008_v13  ;;  %v5702_v3 = vld [vmem:[#allocation9 + $0xb8] sm:$0xff]  }
 0x134   : > { %4497 = vmatprep.subr.bf16.mxu0 %v5003_v30  ;;  %6099 = vst [vmem:[#allocation14_spill] sm:$0xff] %v5702_v3 }
 0x136   : > { %1964 = vmatmul.mubr.bf16.vlgmr.msra.gmra.mxu0 %v4106_v1  ;;  %4728 = vmatpush3.bf16.msra.mxu1 %v5008_v13 }
 0x137   : > { %1971 = vmatprep.mubr.bf16.mxu0 %v4110_v32  ;;  %4498 = vmatpush3.bf16.msra.mxu0 %v5004_v16 }
 0x138   : > { %4499 = vmatprep.subr.bf16.mxu0 %v5006_v39  ;;  %4729 = vmatprep.subr.bf16.mxu1 %v5011_v54 }
 0x139   : > { %4722 = vmatmul.mubr.bf16.gmra.mxu1 %v4117_v24 }
 0x13a   : > { %4730 = vmatpush3.bf16.msra.mxu1 %v5011_v54 }
 0x13b   : > { %4500 = vmatpush3.bf16.msra.mxu0 %v5007_v40  ;;  %4731 = vmatprep.subr.bf16.mxu1 %v5014_v44 }
 0x13c   : > { %4501 = vmatprep.subr.bf16.mxu0 %v5009_v8 }
 0x13e   : > { %1972 = vmatmul.mubr.bf16.gmra.mxu0 %v4109_v31  ;;  %4732 = vmatpush3.bf16.msra.mxu1 %v5014_v44 }
 0x13f   : > { %1979 = vmatprep.mubr.bf16.mxu0 %v4113_v43  ;;  %4502 = vmatpush3.bf16.msra.mxu0 %v5010_v61 }
 0x140   : > { %4503 = vmatprep.subr.bf16.mxu0 %v5012_v41  ;;  %4733 = vmatprep.subr.bf16.mxu1 %v5017_v49 }
 0x142   : > { %4734 = vmatpush3.bf16.msra.mxu1 %v5017_v49 }
 0x143   : > { %4504 = vmatpush3.bf16.msra.mxu0 %v5013_v42  ;;  %4735 = vmatprep.subr.bf16.mxu1 %v5020_v53 }
 0x144   : > { %4505 = vmatprep.subr.bf16.mxu0 %v5015_v46 }
 0x146   : > { %1980 = vmatmul.mubr.bf16.gmra.mxu0 %v4112_v36  ;;  %4736 = vmatpush3.bf16.msra.mxu1 %v5020_v53 }
 0x147   : > { %1987 = vmatprep.mubr.bf16.mxu0 %v4116_v37  ;;  %4506 = vmatpush3.bf16.msra.mxu0 %v5016_v48 }
 0x148   : > { %4507 = vmatprep.subr.bf16.mxu0 %v5018_v51  ;;  %4737 = vmatprep.subr.bf16.mxu1 %v5023_v56 }
 0x14a   : > { %4738 = vmatpush3.bf16.msra.mxu1 %v5023_v56 }
 0x14b   : > { %4508 = vmatpush3.bf16.msra.mxu0 %v5019_v52  ;;  %4739 = vmatprep.subr.bf16.mxu1 %v5031_v18 }
 0x14c   : > { %4509 = vmatprep.subr.bf16.mxu0 %v5021_v55 }
 0x14e   : > { %1988 = vmatmul.mubr.bf16.gmra.mxu0 %v4115_v38  ;;  %4740 = vmatpush3.bf16.msra.mxu1 %v5031_v18 }
 0x14f   : > { %4510 = vmatpush3.bf16.msra.mxu0 %v5022_v57  ;;  %4749 = vmatprep.subr.bf16.mxu1 %v5702_v3 }
 0x150   : > { %4511 = vmatprep.subr.bf16.mxu0 %v5024_v59 }
 0x153   : > { %4512 = vmatpush3.bf16.msra.mxu0 %v5030_v25 }
 0x154   : > { %4549 = vmatprep.subr.bf16.mxu0 %v5032_v2 }
 0x1b0   : > { %v5705_v58 = vpop.f32.mrf.mxu1 }
 0x1b2   : > { %v1217_v0 = vpop.f32.mrf.mxu1 }
 0x1b4   : > { %v5707_v17 = vpop.f32.mrf.mxu1 }
 0x1b5   : > { %v4357_v5 = vpop.f32.mrf.mxu0 }
 0x1b6   : > { %v1220_v11 = vpop.f32.mrf.mxu1 }
 0x1b7   : > { %v4358_v4 = vpop.f32.mrf.mxu0 }
 0x1b8   : > { %v4359_v44 = vadd.f32 %v4358_v4, %v4357_v5 }
 0x1b9   : > { %v4360_v7 = vpop.f32.mrf.mxu0 }
 0x1ba   : > { %v1218_v52 = vadd.f32 %v4359_v44, %v1217_v0  ;;  %v5744_v0 = vld [vmem:[%s6074_s2] ss:$0 sm:$0xff] }
 0x1bb   : > { %v4361_v9 = vpop.f32.mrf.mxu0 }
 0x1bc   : > { %v5709_v23 = vpop.f32.mrf.mxu1  ;;  %v4362_v53 = vadd.f32 %v4361_v9, %v4360_v7 }
 0x1bd   : > { %v4363_v12 = vpop.f32.mrf.mxu0 }
 0x1be   : > { %v5711_v32 = vpop.f32.mrf.mxu1  ;;  %v1221_v62 = vadd.f32 %v4362_v53, %v1220_v11 }
 0x1bf   : > { %v4364_v47 = vpop.f32.mrf.mxu0 }
 0x1c0   : > { %v5713_v22 = vpop.f32.mrf.mxu1  ;;  %v4365_v63 = vadd.f32 %v4364_v47, %v4363_v12 }
 0x1c1   : > { %v4366_v10 = vpop.f32.mrf.mxu0 }
 0x1c2   : > { %v5719_v28 = vpop.f32.mrf.mxu1  ;;  %v1226_v9 = vadd.f32 %v5705_v58, %v4365_v63 }
 0x1c3   : > { %v4367_v1 = vpop.f32.mrf.mxu0 }
 0x1c5   : > { %v4369_v14 = vpop.f32.mrf.mxu0 }
 0x1c7   : > { %v4370_v15 = vpop.f32.mrf.mxu0 }
 0x1c8   : > { %v4371_v11 = vadd.f32 %v4370_v15, %v4369_v14 }
 0x1c9   : > { %v4372_v20 = vpop.f32.mrf.mxu0 }
 0x1ca   : > { %v1234_v15 = vadd.f32 %v4371_v11, %v5711_v32 }
 0x1cb   : > { %v4373_v21 = vpop.f32.mrf.mxu0 }
 0x1cc   : > { %v4374_v12 = vadd.f32 %v4373_v21, %v4372_v20 }
 0x1cd   : > { %v5715_v24 = vpop.f32.mrf.mxu0 }
 0x1ce   : > { %v1237_v20 = vadd.f32 %v4374_v12, %v5719_v28 }
 0x1cf   : > { %v5717_v27 = vpop.f32.mrf.mxu0 }
 0x1d1   : > { %v4378_v50 = vpop.f32.mrf.mxu0  ;;  %v5721_v19 = vpop.f32.mrf.mxu1 }
 0x1d3   : > { %v4379_v31 = vpop.f32.mrf.mxu0  ;;  %v1515_v43 = vpop.f32.mrf.mxu1 }
 0x1d5   : > { %v5723_v26 = vpop.f32.mrf.mxu1 }
 0x1d6   : > { %v4409_v33 = vpop.f32.mrf.mxu0 }
 0x1d7   : > { %v1518_v36 = vpop.f32.mrf.mxu1 }
 0x1d8   : > { %v4410_v6 = vpop.f32.mrf.mxu0 }
 0x1d9   : > { %v5725_v30 = vpop.f32.mrf.mxu1  ;;  %v4411_v49 = vadd.f32 %v4410_v6, %v4409_v33 }
 0x1da   : > { %v4412_v34 = vpop.f32.mrf.mxu0  ;;  %6100 = vst [vmem:[#allocation15_spill] sm:$0xff] %v5725_v30  ;;  %v4368_v30 = vadd.f32 %v4367_v1, %v4366_v10 }
 0x1db   : > { %v5727_v39 = vpop.f32.mrf.mxu1  ;;  %v1451_v57 = vadd.f32 %v4411_v49, %v1218_v52  ;;  %v4380_v49 = vadd.f32 %v4379_v31, %v4378_v50 }
 0x1dc   : > { %v4413_v29 = vpop.f32.mrf.mxu0  ;;  %v1229_v1 = vadd.f32 %v5707_v17, %v4368_v30 }
 0x1dd   : > { %v5729_v8 = vpop.f32.mrf.mxu1  ;;  %v4414_v59 = vadd.f32 %v4413_v29, %v4412_v34  ;;  %v1516_v3 = vadd.f32 %v1515_v43, %v1451_v57  ;;  %v1245_v31 = vadd.f32 %v5713_v22, %v4380_v49 }
 0x1de   : > { %v4415_v45 = vpop.f32.mrf.mxu0  ;;  %6101 = vst [vmem:[#allocation16_spill] sm:$0xff] %v5729_v8 }
 0x1df   : > { %v5733_v41 = vpop.f32.mrf.mxu1  ;;  %v1454_v5 = vadd.f32 %v4414_v59, %v1221_v62 }
 0x1e0   : > { %v4416_v37 = vpop.f32.mrf.mxu0 }
 0x1e1   : > { %v4417_v4 = vadd.f32 %v4416_v37, %v4415_v45  ;;  %v1519_v43 = vadd.f32 %v1518_v36, %v1454_v5  ;;  %v4377_v37 = vadd.f32 %v5717_v27, %v5715_v24 }
 0x1e2   : > { %v4418_v38 = vpop.f32.mrf.mxu0 }
 0x1e3   : > { %v1459_v44 = vadd.f32 %v4417_v4, %v1226_v9  ;;  %v1242_v50 = vadd.f32 %v5709_v23, %v4377_v37 }
 0x1e4   : > { %v4419_v16 = vpop.f32.mrf.mxu0 }
 0x1e5   : > { %v4420_v47 = vadd.f32 %v4419_v16, %v4418_v38  ;;  %v1524_v17 = vadd.f32 %v5721_v19, %v1459_v44 }
 0x1e6   : > { %v4421_v35 = vpop.f32.mrf.mxu0 }
 0x1e7   : > { %v1462_v21 = vadd.f32 %v4420_v47, %v1229_v1 }
 0x1e8   : > { %v4422_v40 = vpop.f32.mrf.mxu0 }
 0x1e9   : > { %v4423_v36 = vadd.f32 %v4422_v40, %v4421_v35  ;;  %v1527_v40 = vadd.f32 %v5723_v26, %v1462_v21 }
 0x1ea   : > { %v4424_v13 = vpop.f32.mrf.mxu0 }
 0x1ec   : > { %v4425_v61 = vpop.f32.mrf.mxu0 }
 0x1ee   : > { %v5731_v54 = vpop.f32.mrf.mxu0 }
 0x1f0   : > { %v5735_v42 = vpop.f32.mrf.mxu0 }
 0x1f1   : > { %v4719_v46 = vpop.f32.mrf.mxu1 }
 0x1f2   : > { %v5737_v48 = vpop.f32.mrf.mxu0 }
 0x1f3   : > { %v2030_v55 = vpop.f32.mrf.mxu1 }
 0x1f4   : > { %v5739_v51 = vpop.f32.mrf.mxu0 }
 0x1f5   : > { %v4720_v25 = vpop.f32.mrf.mxu1  ;;  %v4432_v26 = vadd.f32 %v5739_v51, %v5737_v48 }
 0x1f6   : > { %v4461_v56 = vpop.f32.mrf.mxu0 }
 0x1f7   : > { %v2033_v34 = vpop.f32.mrf.mxu1 }
 0x1f8   : > { %v4462_v60 = vpop.f32.mrf.mxu0 }
 0x1f9   : > { %v4463_v18 = vadd.f32 %v4462_v60, %v4461_v56  ;;  %v5753_v38 = vpop.f32.mrf.mxu1  ;;  %v1467_v56 = vadd.f32 %v4423_v36, %v1234_v15 }
 0x1fa   : > { %v4464_v2 = vpop.f32.mrf.mxu0 }
 0x1fb   : > { %v2031_v8 = vadd.f32 %v4463_v18, %v2030_v55  ;;  %v2046_v59 = vpop.f32.mrf.mxu1 }
 0x1fc   : > { %v4465_v7 = vpop.f32.mrf.mxu0 }
 0x1fd   : > { %v2061_v33 = vadd.f32 %v2031_v8, %v1516_v3  ;;  %v4466_v6 = vadd.f32 %v4465_v7, %v4464_v2  ;;  %v4426_v8 = vadd.f32 %v4425_v61, %v4424_v13  ;;  %v4429_v61 = vadd.f32 %v5735_v42, %v5731_v54 }
 0x1fe   : > { %v4467_v29 = vpop.f32.mrf.mxu0  ;;  %v1532_v7 = vadd.f32 %v5727_v39, %v1467_v56  ;;  %v1478_v39 = vadd.f32 %v4432_v26, %v1245_v31 }
 0x1ff   : > { %v2076_v45 = vadd.f32 %v5744_v0, %v2061_v33  ;;  %v2034_v10 = vadd.f32 %v4466_v6, %v2033_v34  ;;  %v1470_v13 = vadd.f32 %v4426_v8, %v1237_v20  ;;  %v5770_v6 = vpop.f32.mrf.mxu1 }
 0x200   : > { %v4468_v52 = vpop.f32.mrf.mxu0 }
 0x201   : > { %vm2084_vm7 = vcmp.gt.f32.partialorder %v2076_v45, 0.0  ;;  %v2092_v3 = vmul.f32 0.2, %v2076_v45  ;;  %v2062_v58 = vadd.f32 %v2034_v10, %v1519_v43  ;;  %v4469_v14 = vadd.f32 %v4468_v52, %v4467_v29  ;;  %v2049_v10 = vpop.f32.mrf.mxu1 }
 0x202   : > { %v4470_v16 = vpop.f32.mrf.mxu0  ;;  %v1535_v48 = vadd.f32 %v5733_v41, %v1470_v13  ;;  %v1475_v43 = vadd.f32 %v4429_v61, %v1242_v50  ;;  %v6103_v50 = vld [vmem:[#allocation16_spill] sm:$0xff] }
 0x203   : > { %v2100_v30 = vsel %vm2084_vm7, %v2076_v45, %v2092_v3  ;;  %v2077_v24 = vadd.f32 %v5744_v0, %v2062_v58  ;;  %v2039_v27 = vadd.f32 %v4719_v46, %v4469_v14  ;;  %v1543_v31 = vadd.f32 %v6103_v50, %v1478_v39 }
 0x204   : > { %v2116_v53 = vrot.slane %v2100_v30, 7  ;;  %v4471_v32 = vpop.f32.mrf.mxu0 }
 0x205   : > { %vm2085_vm8 = vcmp.gt.f32.partialorder %v2077_v24, 0.0  ;;  %v2093_v28 = vmul.f32 0.2, %v2077_v24  ;;  %v2063_v55 = vadd.f32 %v2039_v27, %v1524_v17  ;;  %v4472_v35 = vadd.f32 %v4471_v32, %v4470_v16 }
 0x206   : > { %v2133_v19 = vsel %vm412_vm3, 0.0, %v2116_v53  ;;  %v2141_v57 = vsel %vm412_vm3, %v2116_v53, 0.0  ;;  %v4473_v46 = vpop.f32.mrf.mxu0 }
 0x207   : > { %v4324_v60 = vpack.c.bf16 %v2133_v19, %v2133_v19  ;;  %v4325_v23 = vpack.c.bf16 %v2141_v57, %v2141_v57  ;;  %v2101_v62 = vsel %vm2085_vm8, %v2077_v24, %v2093_v28  ;;  %v2078_v22 = vadd.f32 %v5744_v0, %v2063_v55  ;;  %v6102_v24 = vld [vmem:[#allocation15_spill] sm:$0xff] }
 0x208   : > { %v2117_v63 = vrot.slane %v2101_v62, 7  ;;  %v2042_v18 = vadd.f32 %v4720_v25, %v4472_v35  ;;  %v4474_v2 = vpop.f32.mrf.mxu0  ;;  %v1540_v27 = vadd.f32 %v6102_v24, %v1475_v43 }
 0x209   : > { %2223 = vst [vmem:[#allocation3 + $0x8] sm:$0xf] %v4324_v60  ;;  %2224 = vst [vmem:[#allocation3 + $0xc] sm:$0x1] %v4325_v23  ;;  %vm2086_vm9 = vcmp.gt.f32.partialorder %v2078_v22, 0.0  ;;  %v4475_v4 = vadd.f32 %v4474_v2, %v4473_v46 }
 0x20a   : > { %v2094_v5 = vmul.f32 0.2, %v2078_v22  ;;  %v2134_v9 = vsel %vm412_vm3, 0.0, %v2117_v63  ;;  %v2142_v33 = vsel %vm412_vm3, %v2117_v63, 0.0  ;;  %v2064_v54 = vadd.f32 %v2042_v18, %v1527_v40  ;;  %v4476_v42 = vpop.f32.mrf.mxu0 }
 0x20b   : > { %v4326_v25 = vpack.c.bf16 %v2134_v9, %v2134_v9  ;;  %v4327_v11 = vpack.c.bf16 %v2142_v33, %v2142_v33  ;;  %v2047_v47 = vadd.f32 %v4475_v4, %v2046_v59 }
 0x20c   : > { %v2102_v12 = vsel %vm2086_vm9, %v2078_v22, %v2094_v5  ;;  %v2079_v34 = vadd.f32 %v5744_v0, %v2064_v54  ;;  %v4477_v29 = vpop.f32.mrf.mxu0 }
 0x20d   : > { %v2118_v51 = vrot.slane %v2102_v12, 7  ;;  %2225 = vst [vmem:[#allocation3 + $0x10] sm:$0xf] %v4326_v25  ;;  %2226 = vst [vmem:[#allocation3 + $0x14] sm:$0x1] %v4327_v11  ;;  %v2065_v44 = vadd.f32 %v2047_v47, %v1532_v7  ;;  %v4478_v45 = vadd.f32 %v4477_v29, %v4476_v42 }
 0x20e   : > { %vm2087_vm10 = vcmp.gt.f32.partialorder %v2079_v34, 0.0  ;;  %v2095_v49 = vmul.f32 0.2, %v2079_v34  ;;  %v4479_v52 = vpop.f32.mrf.mxu0 }
 0x20f   : > { %v2135_v1 = vsel %vm412_vm3, 0.0, %v2118_v51  ;;  %v2143_v37 = vsel %vm412_vm3, %v2118_v51, 0.0  ;;  %v2080_v58 = vadd.f32 %v5744_v0, %v2065_v44  ;;  %v2050_v14 = vadd.f32 %v4478_v45, %v2049_v10 }
 0x210   : > { %v4328_v3 = vpack.c.bf16 %v2135_v1, %v2135_v1  ;;  %v4329_v41 = vpack.c.bf16 %v2143_v37, %v2143_v37  ;;  %v2103_v15 = vsel %vm2087_vm10, %v2079_v34, %v2095_v49  ;;  %v4480_v20 = vpop.f32.mrf.mxu0  ;;  %v5777_v21 = vld [vmem:[#allocation3 + $0x8] sm:$0xf]  ;;  %v2466_v36 = vld [vmem:[#allocation3 + $0xc] sm:$0x1] }
 0x211   : > { %v2119_v16 = vrot.slane %v2103_v15, 7  ;;  %vm2088_vm11 = vcmp.gt.f32.partialorder %v2080_v58, 0.0  ;;  %v2096_v17 = vmul.f32 0.2, %v2080_v58  ;;  %v2066_v30 = vadd.f32 %v2050_v14, %v1535_v48  ;;  %v2474_v32 = vld [vmem:[#allocation3 + $0x8] sm:$0xe] }
 0x212   : > { %2227 = vst [vmem:[#allocation3 + $0x18] sm:$0xf] %v4328_v3  ;;  %2228 = vst [vmem:[#allocation3 + $0x1c] sm:$0x1] %v4329_v41  ;;  %v4481_v8 = vadd.f32 %v4480_v20, %v4479_v52  ;;  %v4482_v53 = vpop.f32.mrf.mxu0  ;;  %v4177_v28 = vcombine.low %v5777_v21, %v2466_v36  ;;  %v4185_v63 = vcombine.low %v2474_v32, %v2466_v36 }
 0x213   : > { %v2136_v55 = vsel %vm412_vm3, 0.0, %v2119_v16  ;;  %v2144_v35 = vsel %vm412_vm3, %v2119_v16, 0.0  ;;  %v2104_v40 = vsel %vm2088_vm11, %v2080_v58, %v2096_v17  ;;  %v2081_v56 = vadd.f32 %v5744_v0, %v2066_v30 }
 0x214   : > { %v4330_v19 = vpack.c.bf16 %v2136_v55, %v2136_v55  ;;  %v4331_v57 = vpack.c.bf16 %v2144_v35, %v2144_v35  ;;  %v2120_v59 = vrot.slane %v2104_v40, 7  ;;  %v2055_v46 = vadd.f32 %v5753_v38, %v4481_v8  ;;  %v4483_v60 = vpop.f32.mrf.mxu0  ;;  %v5786_v23 = vld [vmem:[#allocation3 + $0x10] sm:$0xf]  ;;  %v2467_v62 = vld [vmem:[#allocation3 + $0x14] sm:$0x1] }
 0x215   : > { %vm2089_vm12 = vcmp.gt.f32.partialorder %v2081_v56, 0.0  ;;  %v2097_v22 = vmul.f32 0.2, %v2081_v56  ;;  %v4484_v13 = vadd.f32 %v4483_v60, %v4482_v53  ;;  %v2475_v61 = vld [vmem:[#allocation3 + $0x10] sm:$0xe]  ;;  %v4178_v42 = vcombine.low %v5786_v23, %v2467_v62  ;;  %v5037_v60 = vld [vmem:[#allocation9 + $0x70] sm:$0xff]  }
 0x216   : > { %2229 = vst [vmem:[#allocation3 + $0x20] sm:$0xf] %v4330_v19  ;;  %2230 = vst [vmem:[#allocation3 + $0x24] sm:$0x1] %v4331_v57  ;;  %v2137_v18 = vsel %vm412_vm3, 0.0, %v2120_v59  ;;  %v2145_v2 = vsel %vm412_vm3, %v2120_v59, 0.0  ;;  %v2067_v26 = vadd.f32 %v2055_v46, %v1540_v27  ;;  %v4186_v5 = vcombine.low %v2475_v61, %v2467_v62 }
 0x217   : > { %v4332_v4 = vpack.c.bf16 %v2137_v18, %v2137_v18  ;;  %v4333_v7 = vpack.c.bf16 %v2145_v2, %v2145_v2  ;;  %v2105_v38 = vsel %vm2089_vm12, %v2081_v56, %v2097_v22  ;;  %v2058_v9 = vadd.f32 %v5770_v6, %v4484_v13  ;;  %v5039_v2 = vld [vmem:[#allocation9 + $0xb0] sm:$0xff]  }
 0x218   : > { %v2121_v33 = vrot.slane %v2105_v38, 7  ;;  %v2082_v54 = vadd.f32 %v5744_v0, %v2067_v26  ;;  %v2603_v25 = vrot.slane %v4186_v5, 1  ;;  %v2602_v12 = vrot.slane %v4185_v63, 1  ;;  %v5810_v26 = vld [vmem:[#allocation3 + $0x4] sm:$0x1] }
 0x219   : > { %2231 = vst [vmem:[#allocation3 + $0x28] sm:$0xf] %v4332_v4  ;;  %2232 = vst [vmem:[#allocation3 + $0x2c] sm:$0x1] %v4333_v7  ;;  %v2068_v11 = vadd.f32 %v2058_v9, %v1543_v31  ;;  %v2525_v47 = vshll.u32 %v4177_v28, 16  ;;  %v2523_v37 = vshrl.u32 %v4177_v28, 16  ;;  %v4193_v63 = vcombine.low %v5777_v21, %v5786_v23 }
 0x21a   : > { %v2468_v48 = vld [vmem:[#allocation3 + $0x1c] sm:$0x1]  ;;  %v2476_v51 = vld [vmem:[#allocation3 + $0x18] sm:$0xe]  ;;  %v2138_v34 = vsel %vm412_vm3, 0.0, %v2121_v33  ;;  %v2146_v29 = vsel %vm412_vm3, %v2121_v33, 0.0  ;;  %v4195_v45 = vcombine.low %v2602_v12, %v2603_v25 }
 0x21b   : > { %vm2090_vm13 = vcmp.gt.f32.partialorder %v2082_v54, 0.0  ;;  %v2098_v43 = vmul.f32 0.2, %v2082_v54  ;;  %v4334_v6 = vpack.c.bf16 %v2138_v34, %v2138_v34  ;;  %v4335_v39 = vpack.c.bf16 %v2146_v29, %v2146_v29  ;;  %v5796_v10 = vld [vmem:[#allocation3 + $0x18] sm:$0xf]  ;;  %v5033_v28 = vld [vmem:[#allocation9 + $0x38] sm:$0xff]  }
 0x21c   : > { %v2083_v44 = vadd.f32 %v5744_v0, %v2068_v11  ;;  %v2527_v49 = vrot.slane %v2525_v47, 1  ;;  %v2532_v52 = vshll.u32 %v4178_v42, 16  ;;  %4741 = vmatprep.mubr.bf16.mxu1 %v4195_v45  ;;  %v4187_v14 = vcombine.low %v2476_v51, %v2468_v48  ;;  %v5812_v5 = vld [vmem:[#allocation3] sm:$0xe]  ;;  %v5042_v23 = vld [vmem:[#allocation9 + $0x68] sm:$0xff]   ;;  %v6104_v12 = vld [vmem:[#allocation14_spill] sm:$0xff] }
 0x21d   : > { %v2106_v1 = vsel %vm2090_vm13, %v2082_v54, %v2098_v43  ;;  %2233 = vst [vmem:[#allocation3 + $0x30] sm:$0xf] %v4334_v6  ;;  %2234 = vst [vmem:[#allocation3 + $0x34] sm:$0x1] %v4335_v39  ;;  %v2469_v58 = vld [vmem:[#allocation3 + $0x24] sm:$0x1]  ;;  %v4179_v17 = vcombine.low %v5796_v10, %v2468_v48  ;;  %v4169_v43 = vcombine.low %v5812_v5, %v5810_v26 }
 0x21e   : > { %v2122_v3 = vrot.slane %v2106_v1, 7  ;;  %vm2091_vm14 = vcmp.gt.f32.partialorder %v2083_v44, 0.0  ;;  %v2099_v41 = vmul.f32 0.2, %v2083_v44  ;;  %v2528_v15 = vor.u32 %v2527_v49, %v2523_v37  ;;  %v2477_v16 = vld [vmem:[#allocation3 + $0x20] sm:$0xe] }
 0x21f   : > { %v2530_v20 = vshrl.u32 %v4178_v42, 16  ;;  %v2534_v36 = vrot.slane %v2532_v52, 1  ;;  %v5798_v0 = vld [vmem:[#allocation3 + $0x20] sm:$0xf]  ;;  %v4188_v50 = vcombine.low %v2477_v16, %v2469_v58  ;;  %v2604_v55 = vrot.slane %v4187_v14, 1  ;;  %v5045_v39 = vld [vmem:[#allocation9 + $0xa8] sm:$0xff]  }
 0x220   : > { %v2139_v30 = vsel %vm412_vm3, 0.0, %v2122_v3  ;;  %v2147_v24 = vsel %vm412_vm3, %v2122_v3, 0.0  ;;  %v2107_v27 = vsel %vm2091_vm14, %v2083_v44, %v2099_v41  ;;  %v4180_v40 = vcombine.low %v5798_v0, %v2469_v58  ;;  %v5804_v56 = vld [vmem:[#allocation3 + $0x28] sm:$0xf]  ;;  %v2470_v19 = vld [vmem:[#allocation3 + $0x2c] sm:$0x1] }
 0x221   : > { %v4336_v31 = vpack.c.bf16 %v2139_v30, %v2139_v30  ;;  %v4337_v8 = vpack.c.bf16 %v2147_v24, %v2147_v24  ;;  %v2123_v53 = vrot.slane %v2107_v27, 7  ;;  %v2535_v32 = vor.u32 %v2534_v36, %v2530_v20  ;;  %v2478_v22 = vld [vmem:[#allocation3 + $0x28] sm:$0xe]  ;;  %v5038_v54 = vld [vmem:[#allocation9 + $0x30] sm:$0xff]   ;;  %v2250_v34 = vld [vmem:[#allocation3 + $0xc] sm:$0x1] }
 0x222   : > { %v2605_v35 = vrot.slane %v4188_v50, 1  ;;  %v2539_v62 = vshll.u32 %v4179_v17, 16  ;;  %v2546_v7 = vshll.u32 %v4180_v40, 16  ;;  %v4181_v33 = vcombine.low %v5804_v56, %v2470_v19  ;;  %v2258_v29 = vld [vmem:[#allocation3 + $0x8] sm:$0xe]  ;;  %v5044_v24 = vld [vmem:[#allocation9 + $0x28] sm:$0xff]  }
 0x223   : > { %2235 = vst [vmem:[#allocation3 + $0x38] sm:$0xf] %v4336_v31  ;;  %2236 = vst [vmem:[#allocation3 + $0x3c] sm:$0x1] %v4337_v8  ;;  %v2140_v57 = vsel %vm412_vm3, 0.0, %v2123_v53  ;;  %v2148_v59 = vsel %vm412_vm3, %v2123_v53, 0.0  ;;  %v4194_v46 = vcombine.low %v2528_v15, %v2535_v32  ;;  %v4189_v11 = vcombine.low %v2478_v22, %v2470_v19 }
 0x224   : > { %v4338_v13 = vpack.c.bf16 %v2140_v57, %v2140_v57  ;;  %v4339_v61 = vpack.c.bf16 %v2148_v59, %v2148_v59  ;;  %v4198_v18 = vcombine.low %v2604_v55, %v2605_v35  ;;  %v2541_v4 = vrot.slane %v2539_v62, 1  ;;  %v5814_v38 = vld [vmem:[#allocation3 + $0x30] sm:$0xf]  ;;  %v2471_v9 = vld [vmem:[#allocation3 + $0x34] sm:$0x1] }
 0x225   : > { %2874 = vmatprep.mubr.bf16.mxu0 %v4194_v46  ;;  %v2537_v21 = vshrl.u32 %v4179_v17, 16  ;;  %v2479_v42 = vld [vmem:[#allocation3 + $0x30] sm:$0xe]  ;;  %v4182_v25 = vcombine.low %v5814_v38, %v2471_v9  ;;  %v2544_v47 = vshrl.u32 %v4180_v40, 16  ;;  %v2548_v48 = vrot.slane %v2546_v7, 1 }
 0x226   : > { %2237 = vst [vmem:[#allocation3 + $0x40] sm:$0xf] %v4338_v13  ;;  %2238 = vst [vmem:[#allocation3 + $0x44] sm:$0x1] %v4339_v61  ;;  %2875 = vmatmul.mubr.bf16.vlgmr.msra.gmra.mxu0 %v4193_v63  ;;  %4742 = vmatmul.mubr.bf16.vlgmr.msra.gmra.mxu1 %v4198_v18  ;;  %v4190_v51 = vcombine.low %v2479_v42, %v2471_v9  ;;  %v2551_v44 = vshrl.u32 %v4181_v33, 16  ;;  %v2553_v45 = vshll.u32 %v4181_v33, 16 }
 0x227   : > { %4550 = vmatpush3.bf16.msra.mxu0 %v5033_v28  ;;  %4750 = vmatpush3.bf16.msra.mxu1 %v6104_v12  ;;  %v2542_v6 = vor.u32 %v2541_v4, %v2537_v21  ;;  %v2560_v1 = vshll.u32 %v4182_v25, 16  ;;  %v5821_v37 = vld [vmem:[#allocation3] sm:$0xf]  ;;  %v2549_v49 = vor.u32 %v2548_v48, %v2544_v47  ;;  %v2606_v52 = vrot.slane %v4189_v11, 1  ;;  %v5823_v58 = vld [vmem:[#allocation3 + $0x8] sm:$0xf] }
 0x228   : > { %4551 = vmatprep.subr.bf16.mxu0 %v5037_v60  ;;  %4751 = vmatprep.subr.bf16.mxu1 %v5039_v2  ;;  %v2607_v3 = vrot.slane %v4190_v51, 1  ;;  %v2558_v41 = vshrl.u32 %v4182_v25, 16  ;;  %v4196_v14 = vcombine.low %v5796_v10, %v5798_v0  ;;  %v2555_v15 = vrot.slane %v2553_v45, 1  ;;  %v5050_v8 = vld [vmem:[#allocation9 + $0x60] sm:$0xff]   ;;  %v5053_v13 = vld [vmem:[#allocation9 + $0x58] sm:$0xff]   ;;  %v5061_v12 = vld [vmem:[#allocation9 + $0x50] sm:$0xff]  }
 0x229   : > { %v2562_v20 = vrot.slane %v2560_v1, 1  ;;  %v4170_v17 = vcombine.low %v2258_v29, %v2250_v34  ;;  %v4197_v30 = vcombine.low %v2542_v6, %v2549_v49  ;;  %v5052_v53 = vld [vmem:[#allocation9 + $0xa0] sm:$0xff]   ;;  %v4161_v40 = vcombine.low %v5821_v37, %v5810_v26  ;;  %v5056_v61 = vld [vmem:[#allocation9 + $0x98] sm:$0xff]   ;;  %v5836_v9 = vld [vmem:[#allocation3 + $0x18] sm:$0xf] }
 0x22a   : > { %v5827_v36 = vld [vmem:[#allocation3 + $0x38] sm:$0xf]  ;;  %v2472_v16 = vld [vmem:[#allocation3 + $0x3c] sm:$0x1]  ;;  %v4201_v27 = vcombine.low %v2606_v52, %v2607_v3  ;;  %v2556_v32 = vor.u32 %v2555_v15, %v2551_v44  ;;  %v4162_v19 = vcombine.low %v5823_v58, %v2250_v34  ;;  %v5051_v60 = vld [vmem:[#allocation9 + $0x20] sm:$0xff]   ;;  %v2385_v62 = vrot.slane %v4169_v43, 1 }
 0x22b   : > { %4552 = vmatpush3.bf16.msra.mxu0 %v5038_v54  ;;  %4752 = vmatpush3.bf16.msra.mxu1 %v5039_v2  ;;  %v2480_v50 = vld [vmem:[#allocation3 + $0x38] sm:$0xe]  ;;  %v4183_v31 = vcombine.low %v5827_v36, %v2472_v16  ;;  %v2563_v10 = vor.u32 %v2562_v20, %v2558_v41  ;;  %v2386_v2 = vrot.slane %v4170_v17, 1  ;;  %v2308_v4 = vshll.u32 %v4161_v40, 16  ;;  %v5838_v42 = vld [vmem:[#allocation3 + $0x1c] sm:$0x1] }
 0x22c   : > { %4553 = vmatprep.subr.bf16.mxu0 %v5042_v23  ;;  %4753 = vmatprep.subr.bf16.mxu1 %v5045_v39  ;;  %v4191_v0 = vcombine.low %v2480_v50, %v2472_v16  ;;  %v2315_v7 = vshll.u32 %v4162_v19, 16  ;;  %v4199_v25 = vcombine.low %v5804_v56, %v5814_v38  ;;  %v5055_v11 = vld [vmem:[#allocation9 + $0x18] sm:$0xff]   ;;  %v5068_v48 = vld [vmem:[#allocation9 + $0x90] sm:$0xff]   ;;  %v5842_v29 = vld [vmem:[#allocation3 + $0x10] sm:$0xf]  ;;  %v2306_v6 = vshrl.u32 %v4161_v40, 16 }
 0x22d   : > { %2882 = vmatprep.mubr.bf16.mxu0 %v4197_v30  ;;  %4745 = vmatprep.mubr.bf16.mxu1 %v4201_v27  ;;  %v5830_v28 = vld [vmem:[#allocation3 + $0x40] sm:$0xf]  ;;  %v2473_v55 = vld [vmem:[#allocation3 + $0x44] sm:$0x1]  ;;  %v4200_v57 = vcombine.low %v2556_v32, %v2563_v10  ;;  %v2567_v22 = vshll.u32 %v4183_v31, 16  ;;  %v2565_v54 = vshrl.u32 %v4183_v31, 16  ;;  %v4231_v47 = vcombine.low %v2385_v62, %v2386_v2 }
 0x22e   : > { %v2481_v35 = vld [vmem:[#allocation3 + $0x40] sm:$0xe]  ;;  %2883 = vmatmul.mubr.bf16.gmra.mxu0 %v4196_v14  ;;  %v4184_v59 = vcombine.low %v5830_v28, %v2473_v55  ;;  %v2608_v63 = vrot.slane %v4191_v0, 1  ;;  %v5844_v43 = vld [vmem:[#allocation3 + $0x14] sm:$0x1]  ;;  %v2317_v44 = vrot.slane %v2315_v7, 1  ;;  %v4164_v45 = vcombine.low %v5836_v9, %v5838_v42 }
 0x22f   : > { %v4192_v46 = vcombine.low %v2481_v35, %v2473_v55  ;;  %4554 = vmatpush3.bf16.msra.mxu0 %v5044_v24  ;;  %4754 = vmatpush3.bf16.msra.mxu1 %v5045_v39  ;;  %v2569_v5 = vrot.slane %v2567_v22, 1  ;;  %v2310_v39 = vrot.slane %v2308_v4, 1  ;;  %v5062_v38 = vld [vmem:[#allocation9 + $0x10] sm:$0xff]   ;;  %v2313_v1 = vshrl.u32 %v4162_v19, 16  ;;  %v5069_v52 = vld [vmem:[#allocation9 + $0x48] sm:$0xff]   ;;  %v5073_v30 = vld [vmem:[#allocation9 + $0x40] sm:$0xff]  }
 0x230   : > { %4555 = vmatprep.subr.bf16.mxu0 %v5050_v8  ;;  %4755 = vmatprep.subr.bf16.mxu1 %v5052_v53  ;;  %v2574_v26 = vshll.u32 %v4184_v59, 16  ;;  %v2572_v21 = vshrl.u32 %v4184_v59, 16  ;;  %v4163_v49 = vcombine.low %v5842_v29, %v5844_v43  ;;  %v5072_v3 = vld [vmem:[#allocation9 + $0x88] sm:$0xff]   ;;  %v2329_v15 = vshll.u32 %v4164_v45, 16  ;;  %v5850_v20 = vld [vmem:[#allocation3 + $0x28] sm:$0xf] }
 0x231   : > { %v2609_v18 = vrot.slane %v4192_v46, 1  ;;  %2890 = vmatprep.mubr.bf16.mxu0 %v4200_v57  ;;  %v2570_v51 = vor.u32 %v2569_v5, %v2565_v54  ;;  %v2311_v41 = vor.u32 %v2310_v39, %v2306_v6  ;;  %v2318_v14 = vor.u32 %v2317_v44, %v2313_v1  ;;  %v2254_v16 = vld [vmem:[#allocation3 + $0x2c] sm:$0x1]  ;;  %v5071_v17 = vld [vmem:[#allocation9 + $0x8] sm:$0xff]   ;;  %v5854_v31 = vld [vmem:[#allocation3 + $0x20] sm:$0xf] }
 0x232   : > { %v2576_v23 = vrot.slane %v2574_v26, 1  ;;  %v2260_v24 = vld [vmem:[#allocation3 + $0x18] sm:$0xe]  ;;  %v2322_v27 = vshll.u32 %v4163_v49, 16  ;;  %v4202_v50 = vcombine.low %v5827_v36, %v5830_v28  ;;  %v2253_v8 = vld [vmem:[#allocation3 + $0x24] sm:$0x1]  ;;  %v5857_v35 = vcombine.low %v5850_v20, %v2254_v16 }
 0x233   : > { %v4204_v33 = vcombine.low %v2608_v63, %v2609_v18  ;;  %4556 = vmatpush3.bf16.msra.mxu0 %v5051_v60  ;;  %4756 = vmatpush3.bf16.msra.mxu1 %v5052_v53  ;;  %v2262_v53 = vld [vmem:[#allocation3 + $0x28] sm:$0xe]  ;;  %v4230_v32 = vcombine.low %v2311_v41, %v2318_v14  ;;  %v5075_v10 = vld [vmem:[#allocation9 + $0x80] sm:$0xff]   ;;  %v2331_v55 = vrot.slane %v2329_v15, 1  ;;  %v4172_v40 = vcombine.low %v2260_v24, %v5838_v42  ;;  %v2261_v19 = vld [vmem:[#allocation3 + $0x20] sm:$0xe] }
 0x234   : > { %4557 = vmatprep.subr.bf16.mxu0 %v5053_v13  ;;  %4757 = vmatprep.subr.bf16.mxu1 %v5056_v61  ;;  %v2577_v34 = vor.u32 %v2576_v23, %v2572_v21  ;;  %v2259_v0 = vld [vmem:[#allocation3 + $0x10] sm:$0xe]  ;;  %v2324_v36 = vrot.slane %v2322_v27, 1  ;;  %v2327_v28 = vshrl.u32 %v4164_v45, 16  ;;  %v5861_v59 = vcombine.low %v5854_v31, %v2253_v8  ;;  %v5076_v60 = vld [vmem:[#allocation9 + $0x1f8] sm:$0xff]   ;;  %v5089_v45 = vld [vmem:[#allocation9 + $0x230] sm:$0xff]  }
 0x235   : > { %4746 = vmatmul.mubr.bf16.gmra.mxu1 %v4204_v33  ;;  %v5074_v57 = vld [vmem:[#allocation9] sm:$0xff]   ;;  %v4174_v46 = vcombine.low %v2262_v53, %v2254_v16  ;;  %v4171_v62 = vcombine.low %v2259_v0, %v5844_v43  ;;  %v2320_v22 = vshrl.u32 %v4163_v49, 16  ;;  %v4173_v63 = vcombine.low %v2261_v19, %v2253_v8  ;;  %v5077_v2 = vld [vmem:[#allocation9 + $0x1b8] sm:$0xff]   ;;  %v5867_v4 = vld [vmem:[#allocation3 + $0x38] sm:$0xf] }
 0x236   : > { %2891 = vmatmul.mubr.bf16.gmra.mxu0 %v4199_v25  ;;  %4765 = vmatprep.mubr.bf16.mxu1 %v4231_v47  ;;  %v4203_v56 = vcombine.low %v2570_v51, %v2577_v34  ;;  %v2332_v13 = vor.u32 %v2331_v55, %v2327_v28  ;;  %v2343_v18 = vshll.u32 %v5857_v35, 16  ;;  %v2388_v26 = vrot.slane %v4172_v40, 1  ;;  %v5865_v5 = vld [vmem:[#allocation3 + $0x30] sm:$0xf]  ;;  %v2256_v7 = vld [vmem:[#allocation3 + $0x3c] sm:$0x1] }
 0x237   : > { %4558 = vmatpush3.bf16.msra.mxu0 %v5055_v11  ;;  %4758 = vmatpush3.bf16.msra.mxu1 %v5056_v61  ;;  %v5082_v61 = vld [vmem:[#allocation9 + $0x238] sm:$0xff]   ;;  %v2325_v33 = vor.u32 %v2324_v36, %v2320_v22  ;;  %v2390_v54 = vrot.slane %v4174_v46, 1  ;;  %v2336_v21 = vshll.u32 %v5861_v59, 16  ;;  %v2255_v23 = vld [vmem:[#allocation3 + $0x34] sm:$0x1]  ;;  %v4229_v25 = vcombine.low %v5821_v37, %v5823_v58  ;;  %v5088_v49 = vld [vmem:[#allocation9 + $0x1b0] sm:$0xff]  }
 0x238   : > { %4559 = vmatprep.subr.bf16.mxu0 %v5061_v12  ;;  %4759 = vmatprep.subr.bf16.mxu1 %v5068_v48  ;;  %v2264_v42 = vld [vmem:[#allocation3 + $0x38] sm:$0xe]  ;;  %v2387_v11 = vrot.slane %v4171_v62, 1  ;;  %v5087_v12 = vld [vmem:[#allocation9 + $0x1f0] sm:$0xff]   ;;  %v3280_v47 = vld [vmem:[#allocation3 + $0x1c] sm:$0x1]  ;;  %v4168_v39 = vcombine.low %v5867_v4, %v2256_v7  ;;  %v4232_v55 = vcombine.low %v5842_v29, %v5836_v9 }
 0x239   : > { %2898 = vmatprep.mubr.bf16.mxu0 %v4203_v56  ;;  %v4233_v51 = vcombine.low %v2325_v33, %v2332_v13  ;;  %v2389_v34 = vrot.slane %v4173_v63, 1  ;;  %v2345_v43 = vrot.slane %v2343_v18, 1  ;;  %v2263_v6 = vld [vmem:[#allocation3 + $0x30] sm:$0xe]  ;;  %v2341_v56 = vshrl.u32 %v5857_v35, 16  ;;  %v5090_v14 = vld [vmem:[#allocation9 + $0x1e8] sm:$0xff]  }
 0x23a   : > { %v4234_v44 = vcombine.low %v2387_v11, %v2388_v26  ;;  %v3279_v37 = vld [vmem:[#allocation3 + $0x14] sm:$0x1]  ;;  %v3287_v58 = vld [vmem:[#allocation3 + $0x10] sm:$0xe]  ;;  %v4175_v15 = vcombine.low %v2263_v6, %v2255_v23  ;;  %v2334_v16 = vshrl.u32 %v5861_v59, 16  ;;  %v2357_v24 = vshll.u32 %v4168_v39, 16 }
 0x23b   : > { %4560 = vmatpush3.bf16.msra.mxu0 %v5062_v38  ;;  %4760 = vmatpush3.bf16.msra.mxu1 %v5068_v48  ;;  %v3288_v48 = vld [vmem:[#allocation3 + $0x18] sm:$0xe]  ;;  %v4176_v38 = vcombine.low %v2264_v42, %v2256_v7  ;;  %v4237_v1 = vcombine.low %v2389_v34, %v2390_v54  ;;  %v5098_v40 = vld [vmem:[#allocation9 + $0x1e0] sm:$0xff]   ;;  %v2355_v13 = vshrl.u32 %v4168_v39, 16  ;;  %v5109_v26 = vld [vmem:[#allocation9 + $0x218] sm:$0xff]   ;;  %v4235_v42 = vcombine.low %v5854_v31, %v5850_v20 }
 0x23c   : > { %4561 = vmatprep.subr.bf16.mxu0 %v5069_v52  ;;  %4761 = vmatprep.subr.bf16.mxu1 %v5072_v3  ;;  %v2338_v52 = vrot.slane %v2336_v21, 1  ;;  %v4274_v41 = vcombine.low %v3288_v48, %v3280_v47  ;;  %v5876_v8 = vld [vmem:[#allocation3 + $0x18] sm:$0xf]  ;;  %v2391_v35 = vrot.slane %v4175_v15, 1  ;;  %v5880_v19 = vld [vmem:[#allocation3 + $0x10] sm:$0xf] }
 0x23d   : > { %v2392_v27 = vrot.slane %v4176_v38, 1  ;;  %v5092_v53 = vld [vmem:[#allocation9 + $0x1a8] sm:$0xff]   ;;  %v4266_v36 = vcombine.low %v5876_v8, %v3280_v47  ;;  %v2359_v59 = vrot.slane %v2357_v24, 1  ;;  %v4265_v62 = vcombine.low %v5880_v19, %v3279_v37  ;;  %v5104_v9 = vld [vmem:[#allocation9 + $0x1a0] sm:$0xff]   ;;  %v5884_v7 = vld [vmem:[#allocation3 + $0x28] sm:$0xf] }
 0x23e   : > { %2899 = vmatmul.mubr.bf16.gmra.mxu0 %v4202_v50  ;;  %v5097_v50 = vld [vmem:[#allocation9 + $0x228] sm:$0xff]   ;;  %v5886_v33 = vld [vmem:[#allocation3 + $0x2c] sm:$0x1]  ;;  %v5890_v11 = vld [vmem:[#allocation3 + $0x20] sm:$0xf] }
 0x23f   : > { %4562 = vmatpush3.bf16.msra.mxu0 %v5071_v17  ;;  %3172 = vmatprep.mubr.bf16.mxu0 %v4230_v32  ;;  %v2346_v17 = vor.u32 %v2345_v43, %v2341_v56  ;;  %v2339_v32 = vor.u32 %v2338_v52, %v2334_v16  ;;  %v4240_v46 = vcombine.low %v2391_v35, %v2392_v27  ;;  %v5108_v54 = vld [vmem:[#allocation9 + $0x198] sm:$0xff]   ;;  %v5112_v34 = vld [vmem:[#allocation9 + $0x210] sm:$0xff]   ;;  %v3343_v39 = vshrl.u32 %v4266_v36, 16  ;;  %v5113_v31 = vld [vmem:[#allocation9 + $0x1c8] sm:$0xff]  }
 0x240   : > { %4563 = vmatprep.subr.bf16.mxu0 %v5073_v30  ;;  %4762 = vmatpush3.bf16.msra.mxu1 %v5072_v3  ;;  %v4167_v3 = vcombine.low %v5865_v5, %v2255_v23  ;;  %v4273_v30 = vcombine.low %v3287_v58, %v3279_v37  ;;  %v2360_v18 = vor.u32 %v2359_v59, %v2355_v13  ;;  %v3338_v23 = vshll.u32 %v4265_v62, 16  ;;  %v5111_v43 = vld [vmem:[#allocation9 + $0x190] sm:$0xff]   ;;  %v5116_v38 = vld [vmem:[#allocation9 + $0x208] sm:$0xff]   ;;  %v5117_v52 = vld [vmem:[#allocation9 + $0x1c0] sm:$0xff]  }
 0x241   : > { %4763 = vmatprep.subr.bf16.mxu1 %v5075_v10  ;;  %v5898_v37 = vld [vmem:[#allocation3 + $0x38] sm:$0xf]  ;;  %v3284_v58 = vld [vmem:[#allocation3 + $0x3c] sm:$0x1]  ;;  %v5902_v15 = vld [vmem:[#allocation3 + $0x30] sm:$0xf] }
 0x242   : > { %v2350_v0 = vshll.u32 %v4167_v3, 16  ;;  %v3415_v28 = vrot.slane %v4273_v30, 1  ;;  %v2348_v63 = vshrl.u32 %v4167_v3, 16  ;;  %v3340_v6 = vrot.slane %v3338_v23, 1  ;;  %v3290_v3 = vld [vmem:[#allocation3 + $0x28] sm:$0xe] }
 0x243   : > { %4564 = vmatpush3.bf16.msra.mxu0 %v5074_v57  ;;  %v4236_v57 = vcombine.low %v2339_v32, %v2346_v17  ;;  %v3283_v16 = vld [vmem:[#allocation3 + $0x34] sm:$0x1]  ;;  %v3292_v17 = vld [vmem:[#allocation3 + $0x38] sm:$0xe]  ;;  %v3289_v24 = vld [vmem:[#allocation3 + $0x20] sm:$0xe]  ;;  %v4276_v32 = vcombine.low %v3290_v3, %v5886_v33 }
 0x244   : > { %4764 = vmatpush3.bf16.msra.mxu1 %v5075_v10  ;;  %4601 = vmatprep.subr.bf16.mxu0 %v5076_v60  ;;  %v3416_v10 = vrot.slane %v4274_v41, 1  ;;  %v5105_v60 = vld [vmem:[#allocation9 + $0x220] sm:$0xff]   ;;  %v2352_v29 = vrot.slane %v2350_v0, 1  ;;  %v4278_v35 = vcombine.low %v3292_v17, %v3284_v58 }
 0x245   : > { %4773 = vmatprep.subr.bf16.mxu1 %v5082_v61  ;;  %v5118_v0 = vld [vmem:[#allocation9 + $0x180] sm:$0xff]  }
 0x246   : > { %3173 = vmatmul.mubr.bf16.vlgmr.msra.gmra.mxu0 %v4229_v25  ;;  %v4283_v22 = vcombine.low %v3415_v28, %v3416_v10  ;;  %v2353_v21 = vor.u32 %v2352_v29, %v2348_v63  ;;  %v5110_v25 = vld [vmem:[#allocation9 + $0x1d0] sm:$0xff]   ;;  %v3291_v10 = vld [vmem:[#allocation3 + $0x30] sm:$0xe]  ;;  %v3420_v13 = vrot.slane %v4278_v35, 1 }
 0x247   : > { %4602 = vmatpush3.bf16.msra.mxu0 %v5077_v2  ;;  %3180 = vmatprep.mubr.bf16.mxu0 %v4233_v51  ;;  %v3345_v2 = vshll.u32 %v4266_v36, 16  ;;  %v4268_v51 = vcombine.low %v5884_v7, %v5886_v33  ;;  %v4277_v28 = vcombine.low %v3291_v10, %v3283_v16  ;;  %v3293_v63 = vld [vmem:[#allocation3 + $0x40] sm:$0xe] }
 0x248   : > { %4766 = vmatmul.mubr.bf16.vlgmr.msra.gmra.mxu1 %v4234_v44  ;;  %4603 = vmatprep.subr.bf16.mxu0 %v5087_v12  ;;  %v5892_v12 = vld [vmem:[#allocation3 + $0x24] sm:$0x1]  ;;  %v4239_v47 = vcombine.low %v2353_v21, %v2360_v18  ;;  %v3336_v44 = vshrl.u32 %v4265_v62, 16  ;;  %v3418_v62 = vrot.slane %v4276_v32, 1  ;;  %v3294_v18 = vld [vmem:[#allocation3 + $0x48] sm:$0xe] }
 0x249   : > { %4769 = vmatprep.mubr.bf16.mxu1 %v4237_v1  ;;  %4774 = vmatpush3.bf16.msra.mxu1 %v5082_v61  ;;  %v5106_v61 = vld [vmem:[#allocation9 + $0x1d8] sm:$0xff]   ;;  %v3347_v48 = vrot.slane %v3345_v2, 1  ;;  %v4267_v20 = vcombine.low %v5890_v11, %v5892_v12  ;;  %v3359_v56 = vshll.u32 %v4268_v51, 16  ;;  %v5115_v1 = vld [vmem:[#allocation9 + $0x188] sm:$0xff]   ;;  %v4281_v2 = vcombine.low %v5880_v19, %v5876_v8 }
 0x24a   : > { %4775 = vmatprep.subr.bf16.mxu1 %v5089_v45  ;;  %v3419_v21 = vrot.slane %v4277_v28, 1 }
 0x24b   : > { %4604 = vmatpush3.bf16.msra.mxu0 %v5088_v49  ;;  %v3341_v49 = vor.u32 %v3340_v6, %v3336_v44  ;;  %v3352_v41 = vshll.u32 %v4267_v20, 16  ;;  %v3361_v27 = vrot.slane %v3359_v56, 1  ;;  %v4284_v44 = vcombine.low %v5890_v11, %v5884_v7 }
 0x24c   : > { %4605 = vmatprep.subr.bf16.mxu0 %v5090_v14  ;;  %v4238_v14 = vcombine.low %v5865_v5, %v5867_v4  ;;  %v3357_v4 = vshrl.u32 %v4268_v51, 16 }
 0x24d   : > { %4776 = vmatpush3.bf16.msra.mxu1 %v5089_v45  ;;  %v3348_v45 = vor.u32 %v3347_v48, %v3343_v39  ;;  %v3354_v5 = vrot.slane %v3352_v41, 1  ;;  %v4289_v48 = vcombine.low %v3419_v21, %v3420_v13  ;;  %v4287_v41 = vcombine.low %v5902_v15, %v5898_v37 }
 0x24e   : > { %3181 = vmatmul.mubr.bf16.gmra.mxu0 %v4232_v55  ;;  %4777 = vmatprep.subr.bf16.mxu1 %v5097_v50  ;;  %v4269_v55 = vcombine.low %v5902_v15, %v3283_v16  ;;  %v3362_v36 = vor.u32 %v3361_v27, %v3357_v4 }
 0x24f   : > { %4606 = vmatpush3.bf16.msra.mxu0 %v5092_v53  ;;  %3188 = vmatprep.mubr.bf16.mxu0 %v4236_v57  ;;  %v4282_v30 = vcombine.low %v3341_v49, %v3348_v45  ;;  %v5119_v53 = vld [vmem:[#allocation9 + $0x200] sm:$0xff]   ;;  %v3350_v57 = vshrl.u32 %v4267_v20, 16 }
 0x250   : > { %4770 = vmatmul.mubr.bf16.gmra.mxu1 %v4240_v46  ;;  %4607 = vmatprep.subr.bf16.mxu0 %v5098_v40  ;;  %v4275_v40 = vcombine.low %v3289_v24, %v5892_v12  ;;  %v3278_v46 = vld [vmem:[#allocation3 + $0x48] sm:$0xf] }
 0x251   : > { %4778 = vmatpush3.bf16.msra.mxu1 %v5097_v50  ;;  %4789 = vmatprep.mubr.bf16.mxu1 %v4283_v22  ;;  %v4270_v50 = vcombine.low %v5898_v37, %v3284_v58  ;;  %v3277_v22 = vld [vmem:[#allocation3 + $0x40] sm:$0xf]  ;;  %v3355_v29 = vor.u32 %v3354_v5, %v3350_v57 }
 0x252   : > { %4779 = vmatprep.subr.bf16.mxu1 %v5105_v60  ;;  %v4290_v16 = vcombine.low %v3277_v22, %v3278_v46 }
 0x253   : > { %4608 = vmatpush3.bf16.msra.mxu0 %v5104_v9  ;;  %v3373_v59 = vshll.u32 %v4270_v50, 16  ;;  %v3285_v9 = vld [vmem:[#allocation3 + $0x44] sm:$0x1] }
 0x254   : > { %4609 = vmatprep.subr.bf16.mxu0 %v5106_v61  ;;  %v3366_v61 = vshll.u32 %v4269_v55, 16  ;;  %v4279_v12 = vcombine.low %v3293_v63, %v3285_v9 }
 0x255   : > { %4780 = vmatpush3.bf16.msra.mxu1 %v5105_v60  ;;  %v3286_v60 = vld [vmem:[#allocation3 + $0x4c] sm:$0x1]  ;;  %v3375_v23 = vrot.slane %v3373_v59, 1 }
 0x256   : > { %3189 = vmatmul.mubr.bf16.gmra.mxu0 %v4235_v42  ;;  %4781 = vmatprep.subr.bf16.mxu1 %v5109_v26  ;;  %v4272_v33 = vcombine.low %v3278_v46, %v3286_v60  ;;  %v4271_v42 = vcombine.low %v3277_v22, %v3285_v9  ;;  %v3368_v51 = vrot.slane %v3366_v61, 1  ;;  %v3421_v39 = vrot.slane %v4279_v12, 1 }
 0x257   : > { %4610 = vmatpush3.bf16.msra.mxu0 %v5108_v54  ;;  %3196 = vmatprep.mubr.bf16.mxu0 %v4239_v47  ;;  %v4285_v54 = vcombine.low %v3355_v29, %v3362_v36  ;;  %v4280_v47 = vcombine.low %v3294_v18, %v3286_v60 }
 0x258   : > { %4611 = vmatprep.subr.bf16.mxu0 %v5110_v25  ;;  %v3380_v8 = vshll.u32 %v4271_v42, 16  ;;  %v3387_v19 = vshll.u32 %v4272_v33, 16  ;;  %v3378_v49 = vshrl.u32 %v4271_v42, 16 }
 0x259   : > { %4782 = vmatpush3.bf16.msra.mxu1 %v5109_v26  ;;  %v3417_v26 = vrot.slane %v4275_v40, 1  ;;  %v3422_v20 = vrot.slane %v4280_v47, 1 }
 0x25a   : > { %4783 = vmatprep.subr.bf16.mxu1 %v5112_v34  ;;  %v3382_v56 = vrot.slane %v3380_v8, 1  ;;  %v3389_v58 = vrot.slane %v3387_v19, 1 }
 0x25b   : > { %4612 = vmatpush3.bf16.msra.mxu0 %v5111_v43  ;;  %v4286_v25 = vcombine.low %v3417_v26, %v3418_v62  ;;  %v3364_v43 = vshrl.u32 %v4269_v55, 16 }
 0x25c   : > { %4613 = vmatprep.subr.bf16.mxu0 %v5113_v31 }
 0x25d   : > { %4784 = vmatpush3.bf16.msra.mxu1 %v5112_v34  ;;  %v3371_v34 = vshrl.u32 %v4270_v50, 16  ;;  %v3369_v31 = vor.u32 %v3368_v51, %v3364_v43 }
 0x25e   : > { %3197 = vmatmul.mubr.bf16.gmra.mxu0 %v4238_v14  ;;  %4785 = vmatprep.subr.bf16.mxu1 %v5116_v38 }
 0x25f   : > { %4614 = vmatpush3.bf16.msra.mxu0 %v5115_v1  ;;  %3687 = vmatprep.mubr.bf16.mxu0 %v4282_v30  ;;  %v3376_v6 = vor.u32 %v3375_v23, %v3371_v34  ;;  %v4292_v1 = vcombine.low %v3421_v39, %v3422_v20 }
 0x260   : > { %4615 = vmatprep.subr.bf16.mxu0 %v5117_v52  ;;  %v3383_v52 = vor.u32 %v3382_v56, %v3378_v49 }
 0x261   : > { %4786 = vmatpush3.bf16.msra.mxu1 %v5116_v38  ;;  %v4288_v45 = vcombine.low %v3369_v31, %v3376_v6  ;;  %v3385_v38 = vshrl.u32 %v4272_v33, 16 }
 0x262   : > { %4787 = vmatprep.subr.bf16.mxu1 %v5119_v53 }
 0x263   : > { %4616 = vmatpush3.bf16.msra.mxu0 %v5118_v0  ;;  %v3390_v3 = vor.u32 %v3389_v58, %v3385_v38 }
 0x265   : > { %4788 = vmatpush3.bf16.msra.mxu1 %v5119_v53  ;;  %v4291_v14 = vcombine.low %v3383_v52, %v3390_v3 }
 0x266   : > { %3688 = vmatmul.mubr.bf16.vlgmr.msra.gmra.mxu0 %v4281_v2 }
 0x267   : > { %3695 = vmatprep.mubr.bf16.mxu0 %v4285_v54 }
 0x268   : > { %4790 = vmatmul.mubr.bf16.vlgmr.msra.gmra.mxu1 %v4286_v25 }
 0x269   : > { %4793 = vmatprep.mubr.bf16.mxu1 %v4289_v48 }
 0x26e   : > { %3696 = vmatmul.mubr.bf16.gmra.mxu0 %v4284_v44 }
 0x26f   : > { %3703 = vmatprep.mubr.bf16.mxu0 %v4288_v45 }
 0x270   : > { %4794 = vmatmul.mubr.bf16.gmra.mxu1 %v4292_v1 }
 0x276   : > { %3704 = vmatmul.mubr.bf16.gmra.mxu0 %v4287_v41 }
 0x277   : > { %3711 = vmatprep.mubr.bf16.mxu0 %v4291_v14 }
 0x27e   : > { %3712 = vmatmul.mubr.bf16.gmra.mxu0 %v4290_v16 }
 0x2e6   : > { %v4513_v7 = vpop.f32.mrf.mxu0  ;;  %v4743_v24 = vpop.f32.mrf.mxu1 }
 0x2e8   : > { %v4514_v11 = vpop.f32.mrf.mxu0  ;;  %v2941_v53 = vpop.f32.mrf.mxu1 }
 0x2e9   : > { %v4515_v34 = vadd.f32 %v4514_v11, %v4513_v7 }
 0x2ea   : > { %v4516_v17 = vpop.f32.mrf.mxu0  ;;  %v5914_v0 = vpop.f32.mrf.mxu1 }
 0x2eb   : > { %v2942_v39 = vadd.f32 %v4515_v34, %v2941_v53 }
 0x2ec   : > { %v4517_v30 = vpop.f32.mrf.mxu0  ;;  %v2944_v15 = vpop.f32.mrf.mxu1 }
 0x2ed   : > { %v4518_v20 = vadd.f32 %v4517_v30, %v4516_v17  ;;  %v5965_v17 = vld [vmem:[%s6076_s4] ss:$0 sm:$0xff] }
 0x2ee   : > { %v4519_v27 = vpop.f32.mrf.mxu0 }
 0x2ef   : > { %v2945_v49 = vadd.f32 %v4518_v20, %v2944_v15 }
 0x2f0   : > { %v4520_v50 = vpop.f32.mrf.mxu0 }
 0x2f1   : > { %v4521_v38 = vadd.f32 %v4520_v50, %v4519_v27 }
 0x2f2   : > { %v4522_v32 = vpop.f32.mrf.mxu0 }
 0x2f4   : > { %v4523_v10 = vpop.f32.mrf.mxu0 }
 0x2f5   : > { %v5922_v55 = vpop.f32.mrf.mxu1 }
 0x2f6   : > { %v5916_v5 = vpop.f32.mrf.mxu0 }
 0x2f7   : > { %v5928_v57 = vpop.f32.mrf.mxu1 }
 0x2f8   : > { %v5918_v37 = vpop.f32.mrf.mxu0 }
 0x2f9   : > { %v5934_v59 = vpop.f32.mrf.mxu1 }
 0x2fa   : > { %v5920_v4 = vpop.f32.mrf.mxu0 }
 0x2fb   : > { %v5938_v62 = vpop.f32.mrf.mxu1 }
 0x2fc   : > { %v5924_v35 = vpop.f32.mrf.mxu0 }
 0x2fe   : > { %v5926_v40 = vpop.f32.mrf.mxu0 }
 0x300   : > { %v5930_v36 = vpop.f32.mrf.mxu0 }
 0x302   : > { %v5932_v28 = vpop.f32.mrf.mxu0 }
 0x304   : > { %v5936_v46 = vpop.f32.mrf.mxu0 }
 0x306   : > { %v4565_v60 = vpop.f32.mrf.mxu0 }
 0x308   : > { %v4566_v22 = vpop.f32.mrf.mxu0  ;;  %v4767_v9 = vpop.f32.mrf.mxu1 }
 0x309   : > { %v4567_v8 = vadd.f32 %v4566_v22, %v4565_v60  ;;  %v2950_v60 = vadd.f32 %v4743_v24, %v4521_v38  ;;  %v4524_v22 = vadd.f32 %v4523_v10, %v4522_v32  ;;  %v4527_v32 = vadd.f32 %v5918_v37, %v5916_v5 }
 0x30a   : > { %v4568_v29 = vpop.f32.mrf.mxu0  ;;  %v3239_v61 = vpop.f32.mrf.mxu1  ;;  %v4530_v5 = vadd.f32 %v5924_v35, %v5920_v4 }
 0x30b   : > { %v3175_v45 = vadd.f32 %v4567_v8, %v2942_v39  ;;  %v2953_v24 = vadd.f32 %v5914_v0, %v4524_v22 }
 0x30c   : > { %v4569_v13 = vpop.f32.mrf.mxu0  ;;  %v5940_v2 = vpop.f32.mrf.mxu1 }
 0x30d   : > { %v4570_v56 = vadd.f32 %v4569_v13, %v4568_v29  ;;  %v3240_v16 = vadd.f32 %v3239_v61, %v3175_v45 }
 0x30e   : > { %v4571_v63 = vpop.f32.mrf.mxu0  ;;  %v3242_v54 = vpop.f32.mrf.mxu1 }
 0x30f   : > { %v3178_v7 = vadd.f32 %v4570_v56, %v2945_v49 }
 0x310   : > { %v4572_v18 = vpop.f32.mrf.mxu0  ;;  %v5942_v42 = vpop.f32.mrf.mxu1 }
 0x311   : > { %v4573_v3 = vadd.f32 %v4572_v18, %v4571_v63  ;;  %v3243_v18 = vadd.f32 %v3242_v54, %v3178_v7 }
 0x312   : > { %v4574_v26 = vpop.f32.mrf.mxu0  ;;  %v5948_v47 = vpop.f32.mrf.mxu1 }
 0x313   : > { %v3183_v29 = vadd.f32 %v4573_v3, %v2950_v60 }
 0x314   : > { %v4575_v33 = vpop.f32.mrf.mxu0  ;;  %v5954_v43 = vpop.f32.mrf.mxu1 }
 0x315   : > { %v4576_v15 = vadd.f32 %v4575_v33, %v4574_v26 }
 0x316   : > { %v4577_v21 = vpop.f32.mrf.mxu0  ;;  %v5960_v31 = vpop.f32.mrf.mxu1 }
 0x317   : > { %v3186_v26 = vadd.f32 %v4576_v15, %v2953_v24 }
 0x318   : > { %v4578_v23 = vpop.f32.mrf.mxu0 }
 0x319   : > { %v4579_v45 = vadd.f32 %v4578_v23, %v4577_v21  ;;  %v3251_v49 = vadd.f32 %v5940_v2, %v3186_v26 }
 0x31a   : > { %v5944_v25 = vpop.f32.mrf.mxu0 }
 0x31c   : > { %v5946_v12 = vpop.f32.mrf.mxu0 }
 0x31e   : > { %v5950_v48 = vpop.f32.mrf.mxu0 }
 0x320   : > { %v5952_v51 = vpop.f32.mrf.mxu0 }
 0x321   : > { %v4585_v60 = vadd.f32 %v5952_v51, %v5950_v48 }
 0x322   : > { %v5956_v6 = vpop.f32.mrf.mxu0 }
 0x324   : > { %v5958_v19 = vpop.f32.mrf.mxu0 }
 0x326   : > { %v4617_v44 = vpop.f32.mrf.mxu0 }
 0x328   : > { %v4618_v58 = vpop.f32.mrf.mxu0  ;;  %v4791_v1 = vpop.f32.mrf.mxu1 }
 0x329   : > { %v4619_v52 = vadd.f32 %v4618_v58, %v4617_v44  ;;  %v3248_v44 = vadd.f32 %v4767_v9, %v3183_v29  ;;  %v2958_v58 = vadd.f32 %v4527_v32, %v5928_v57  ;;  %v4582_v57 = vadd.f32 %v5946_v12, %v5944_v25 }
 0x32a   : > { %v4620_v41 = vpop.f32.mrf.mxu0  ;;  %v3754_v14 = vpop.f32.mrf.mxu1 }
 0x32b   : > { %v3755_v11 = vadd.f32 %v4619_v52, %v3754_v14  ;;  %v3191_v4 = vadd.f32 %v4579_v45, %v2958_v58  ;;  %v2961_v14 = vadd.f32 %v4530_v5, %v5938_v62 }
 0x32c   : > { %v4621_v30 = vpop.f32.mrf.mxu0  ;;  %v4792_v53 = vpop.f32.mrf.mxu1 }
 0x32d   : > { %v3785_v27 = vadd.f32 %v3755_v11, %v3240_v16  ;;  %v4622_v50 = vadd.f32 %v4621_v30, %v4620_v41  ;;  %v4533_v16 = vadd.f32 %v5930_v36, %v5926_v40  ;;  %v3194_v12 = vadd.f32 %v4582_v57, %v2961_v14 }
 0x32e   : > { %v4623_v13 = vpop.f32.mrf.mxu0  ;;  %v3757_v63 = vpop.f32.mrf.mxu1 }
 0x32f   : > { %v3800_v61 = vadd.f32 %v5965_v17, %v3785_v27  ;;  %v3758_v34 = vadd.f32 %v4622_v50, %v3757_v63  ;;  %v2966_v36 = vadd.f32 %v5922_v55, %v4533_v16  ;;  %v4536_v50 = vadd.f32 %v5936_v46, %v5932_v28 }
 0x330   : > { %v4624_v10 = vpop.f32.mrf.mxu0  ;;  %v5971_v33 = vpop.f32.mrf.mxu1 }
 0x331   : > { %vm3808_vm0 = vcmp.gt.f32.partialorder %v3800_v61, 0.0  ;;  %v3816_v8 = vmul.f32 0.2, %v3800_v61  ;;  %v3786_v39 = vadd.f32 %v3758_v34, %v3243_v18  ;;  %v4625_v20 = vadd.f32 %v4624_v10, %v4623_v13 }
 0x332   : > { %v4626_v54 = vpop.f32.mrf.mxu0  ;;  %v3259_v13 = vadd.f32 %v5960_v31, %v3194_v12  ;;  %v2969_v34 = vadd.f32 %v5934_v59, %v4536_v50 }
 0x333   : > { %v3824_v56 = vsel %vm3808_vm0, %v3800_v61, %v3816_v8  ;;  %v3801_v38 = vadd.f32 %v5965_v17, %v3786_v39  ;;  %v3763_v0 = vadd.f32 %v4791_v1, %v4625_v20  ;;  %v3770_v1 = vpop.f32.mrf.mxu1  ;;  %v4588_v61 = vadd.f32 %v5958_v19, %v5956_v6 }
 0x334   : > { %3833 = vst.msk [vmem:[%s5979_s14] sm:$0xff] %vm3832_vm15, %v3824_v56  ;;  %v4627_v37 = vpop.f32.mrf.mxu0 }
 0x335   : > { %vm3809_vm1 = vcmp.gt.f32.partialorder %v3801_v38, 0.0  ;;  %v3817_v9 = vmul.f32 0.2, %v3801_v38  ;;  %v3787_v21 = vadd.f32 %v3763_v0, %v3248_v44  ;;  %v4628_v23 = vadd.f32 %v4627_v37, %v4626_v54  ;;  %v4796_v22 = vpop.f32.mrf.mxu1 }
 0x336   : > { %v4629_v52 = vpop.f32.mrf.mxu0  ;;  %v3202_v20 = vadd.f32 %v4588_v61, %v2969_v34 }
 0x337   : > { %v3825_v35 = vsel %vm3809_vm1, %v3801_v38, %v3817_v9  ;;  %v3802_v3 = vadd.f32 %v5965_v17, %v3787_v21  ;;  %v3766_v41 = vadd.f32 %v4792_v53, %v4628_v23  ;;  %v3256_v53 = vadd.f32 %v5948_v47, %v3191_v4  ;;  %v3773_v63 = vpop.f32.mrf.mxu1 }
 0x338   : > { %3834 = vst.msk [vmem:[%s5979_s14 + $0x8] sm:$0xff] %vm3832_vm15, %v3825_v35  ;;  %v4630_v7 = vpop.f32.mrf.mxu0  ;;  %v3199_v47 = vadd.f32 %v4585_v60, %v2966_v36 }
 0x339   : > { %vm3810_vm2 = vcmp.gt.f32.partialorder %v3802_v3, 0.0  ;;  %v3818_v2 = vmul.f32 0.2, %v3802_v3  ;;  %v3788_v11 = vadd.f32 %v3766_v41, %v3251_v49  ;;  %v4631_v25 = vadd.f32 %v4630_v7, %v4629_v52 }
 0x33a   : > { %v4632_v30 = vpop.f32.mrf.mxu0  ;;  %v3264_v8 = vadd.f32 %v5942_v42, %v3199_v47  ;;  %v3267_v42 = vadd.f32 %v5954_v43, %v3202_v20 }
 0x33b   : > { %v3826_v62 = vsel %vm3810_vm2, %v3802_v3, %v3818_v2  ;;  %v3803_v27 = vadd.f32 %v5965_v17, %v3788_v11  ;;  %v3771_v40 = vadd.f32 %v4631_v25, %v3770_v1 }
 0x33c   : > { %3835 = vst.msk [vmem:[%s5979_s14 + $0x10] sm:$0xff] %vm3832_vm15, %v3826_v62  ;;  %v4633_v29 = vpop.f32.mrf.mxu0 }
 0x33d   : > { %vm3811_vm3 = vcmp.gt.f32.partialorder %v3803_v27, 0.0  ;;  %v3819_v15 = vmul.f32 0.2, %v3803_v27  ;;  %v3789_v48 = vadd.f32 %v3771_v40, %v3256_v53  ;;  %v4634_v51 = vadd.f32 %v4633_v29, %v4632_v30 }
 0x33e   : > { %v4635_v18 = vpop.f32.mrf.mxu0 }
 0x33f   : > { %v3827_v55 = vsel %vm3811_vm3, %v3803_v27, %v3819_v15  ;;  %v3804_v28 = vadd.f32 %v5965_v17, %v3789_v48  ;;  %v3774_v46 = vadd.f32 %v4634_v51, %v3773_v63 }
 0x340   : > { %3836 = vst.msk [vmem:[%s5979_s14 + $0x18] sm:$0xff] %vm3832_vm15, %v3827_v55  ;;  %v4636_v24 = vpop.f32.mrf.mxu0 }
 0x341   : > { %vm3812_vm4 = vcmp.gt.f32.partialorder %v3804_v28, 0.0  ;;  %v3820_v32 = vmul.f32 0.2, %v3804_v28  ;;  %v3790_v10 = vadd.f32 %v3774_v46, %v3259_v13  ;;  %v4637_v31 = vadd.f32 %v4636_v24, %v4635_v18 }
 0x342   : > { %v4638_v39 = vpop.f32.mrf.mxu0 }
 0x343   : > { %v3828_v6 = vsel %vm3812_vm4, %v3804_v28, %v3820_v32  ;;  %v3805_v19 = vadd.f32 %v5965_v17, %v3790_v10  ;;  %v3779_v44 = vadd.f32 %v5971_v33, %v4637_v31 }
 0x344   : > { %3837 = vst.msk [vmem:[%s5979_s14 + $0x20] sm:$0xff] %vm3832_vm15, %v3828_v6  ;;  %v4639_v59 = vpop.f32.mrf.mxu0 }
 0x345   : > { %vm3813_vm5 = vcmp.gt.f32.partialorder %v3805_v19, 0.0  ;;  %v3821_v26 = vmul.f32 0.2, %v3805_v19  ;;  %v3791_v54 = vadd.f32 %v3779_v44, %v3264_v8  ;;  %v4640_v45 = vadd.f32 %v4639_v59, %v4638_v39 }
 0x347   : > { %v3829_v56 = vsel %vm3813_vm5, %v3805_v19, %v3821_v26  ;;  %v3806_v38 = vadd.f32 %v5965_v17, %v3791_v54  ;;  %v3782_v0 = vadd.f32 %v4796_v22, %v4640_v45 }
 0x348   : > { %3838 = vst.msk [vmem:[%s5979_s14 + $0x28] sm:$0xff] %vm3832_vm15, %v3829_v56 }
 0x349   : > { %vm3814_vm6 = vcmp.gt.f32.partialorder %v3806_v38, 0.0  ;;  %v3822_v33 = vmul.f32 0.2, %v3806_v38  ;;  %v3792_v58 = vadd.f32 %v3782_v0, %v3267_v42 }
 0x34b   : > { %v3830_v5 = vsel %vm3814_vm6, %v3806_v38, %v3822_v33  ;;  %v3807_v37 = vadd.f32 %v5965_v17, %v3792_v58 }
 0x34c   : > { %3839 = vst.msk [vmem:[%s5979_s14 + $0x30] sm:$0xff] %vm3832_vm15, %v3830_v5 }
 0x34d   : > { %vm3815_vm7 = vcmp.gt.f32.partialorder %v3807_v37, 0.0  ;;  %v3823_v43 = vmul.f32 0.2, %v3807_v37 }
 0x34f   : > { %v3831_v9 = vsel %vm3815_vm7, %v3807_v37, %v3823_v43 }
 0x350   : > { %3840 = vst.msk [vmem:[%s5979_s14 + $0x38] sm:$0xff] %vm3832_vm15, %v3831_v9 }
 0x351   : > { %5228 = shalt.err (!%p5225_p3)
}
 0x352   : > { %s5229_s24 = scalar_lea.hbm %s6025_s17, 1024  ;;  %s5233_s10 = scalar_lea.hbm %s6077_s5, 2048 }
 0x353   : > { %p5230_p11 = scmp.ne.s32.totalorder %s6025_s17, %s5229_s24  ;;  %p5234_p4 = scmp.lt.s32.totalorder %s6025_s17, %s6077_s5 }
 0x354   : > { %p5235_p6 = scmp.lt.s32.totalorder %s5233_s10, %s5229_s24 }
 0x355   : > { %p5231_p9 = pnand %p5230_p11, %p6105_p2 }
 0x356   : > { %p5236_p8 = por %p5235_p6, %p5234_p4 }
 0x357   : > { %p5232_p1 = pneg %p5231_p9 }
 0x359   : > { %p5237_p5 = pnand %p5236_p8, %p5232_p1 }
 0x35b   : > { %5240 = shalt.err (!%p5237_p5)
}
 0x35c   : > { %s5294_s6 = smov 128   ;;  %s5295_s28 = smov 8  }
 0x35d   : > { %4807 = dma.vmem_to_hbm [thread:$0]  (%p6105_p2), %s6027_s7, 1024, %s6025_s17, %s3842_s22, %s5294_s6, %s5294_s6, %s5295_s28  }
 0x35e PF: > { %s3870_s11 = sand.u32 1, %s5271_s18   ;;  %p6106_p7 = scmp.ne.s32.totalorder %s6085_s25, 0 }
 0x35f   : > { %p6107_p12 = scmp.ge.s32.totalorder %s5283_s21, 2  ;;  %s3871_s16 = scalar_lea.sflag [#allocation6], %s3870_s11 }
 0x361   : > { %p4821_p13 = pnand %p6107_p12, %p6106_p7 }
 0x363   : > { %p4822_p0 = pneg %p4821_p13 }
 0x365   : > { %5266 = dma.done.wait (%p4822_p0), %s3871_s16, 1024  }
 0x366   : > { %5268 = vsyncadd (%p4822_p0), %s3871_s16, 4294966272  ;;  %p19_p10 = scmp.ge.s32.totalorder %s5404_s15, 4   ;;  %s6108_s18 = smov %s5275_s19 }
 0x367   : > { %s6109_s19 = smov %s5279_s20  ;;  %s6110_s20 = smov %s5420_s27 }
 0x368   : > { %s6111_s21 = smov %s5404_s15  ;;  %21 = sbr.rel (!%p19_p10) target bundleno = 6 (0x6), region = 98 }
 0x36d   :  { %3876 = vsyncpa [#allocation5], 1 }
 0x36e   :  { %3878 = vsyncpa [#allocation5 + $0x1], 1 }
 0x36f   :  { %3879 = vsyncpa [#allocation8], 1 }
 0x370   :  { %3880 = vsyncpa [#allocation6], 1 }
 0x371   :  { %3882 = vsyncpa [#allocation6 + $0x1], 1 }

</bundles_post_ra>
